<compile_context>
chip_gen: v7x
topology: tpu7x:2x2x1
jax: 0.10.0
libtpu: 0.0.40
codegen_flags: <defaults>
</compile_context>

<pallas_src>
import math
from functools import partial

import numpy as np
import jax
import jax.numpy as jnp
from jax.experimental import pallas as pl
from jax.experimental.pallas import tpu as pltpu


_N_COLS = 512          # lane-dense, multiple of 128 -> full-width unmasked stores


def _round_up(v: int, m: int) -> int:
    return ((v + m - 1) // m) * m


def _cplx_amp_to_db_kernel(re_ref, im_ref, ore_ref, oim_ref, *,
                           amin: float, c_log: float, c_phase: float,
                           db_offset: float):
    """Elementwise complex amplitude->dB on (tile_rows, n_cols) f32 planes."""
    re = jnp.maximum(re_ref[...], amin)
    im = jnp.maximum(im_ref[...], amin)

    # real part: multiplier * log10(|z|) - multiplier * db_multiplier
    #   c_log = multiplier * 0.5 / ln(10)   (EUP log, constants folded at trace time)
    mag2 = re * re + im * im
    ore_ref[...] = c_log * jnp.log(mag2) - db_offset

    # imag part: multiplier * arg(z) / ln(10); re, im > 0 so arg(z) = atan(im/re).
    # Single-divide Cephes-style range reduction:
    #   u = lo/hi in (0, 1];  if u > tan(pi/8):  atan(u) = pi/4 + atan((lo-hi)/(lo+hi))
    # so select num/den first and divide once.
    lo = jnp.minimum(im, re)
    hi = jnp.maximum(im, re)
    swap = lo > (0.41421356237309503 * hi)          # tan(pi/8) * hi, no pre-divide
    num = jnp.where(swap, lo - hi, lo)
    den = jnp.where(swap, lo + hi, hi)              # den >= amin > 0, never zero
    x = num / den                                   # the only divide in the kernel
    z = x * x
    p = ((0.0805374449538 * z - 0.138776856032) * z
         + 0.199777106478) * z - 0.333329491539
    atan_core = x + x * z * p                       # atan on |x| <= tan(pi/8)
    atan_u = jnp.where(swap, 0.7853981633974483 + atan_core, atan_core)
    phase = jnp.where(im > re, 1.5707963267948966 - atan_u, atan_u)
    oim_ref[...] = c_phase * phase                  # c_phase = multiplier / ln(10)


class CplxAmplitudeToDBPallas:
    """Pallas-TPU port of CplxAmplitudeToDB (forward only)."""

    def __init__(self, stype: str = "power", top_db=None):
        self.stype = stype
        self.multiplier = 10.0 if stype == "power" else 20.0
        self.amin = 1e-10
        self.ref_value = 1.0
        self.db_multiplier = math.log10(max(self.amin, self.ref_value))
        self.top_db = top_db  # stored but unused, matching the reference forward

        # Per-generation tile cap from physical VMEM:
        #   4 f32 planes (2 in + 2 out) x 2 pipeline buffers resident per step.
        # Keep the kernel footprint <= ~3/8 of physical VMEM, never above 2048 rows:
        #   v5e/v6e (128 MiB) -> 2048x512 rows/step (32 MiB resident)
        #   v7x     ( 64 MiB) -> 1536x512 rows/step (24 MiB resident)
        try:
            info = pltpu.get_tpu_info()
            vmem_bytes = int(getattr(info, "vmem_capacity_bytes", 64 << 20))
        except Exception:
            vmem_bytes = 64 << 20  # conservative (v7x-sized)
        budget = (vmem_bytes * 3) // 8
        cap = (budget // (8 * _N_COLS * 4) // 8) * 8
        self._max_tile_rows = int(max(256, min(2048, cap)))

        self._forward = jax.jit(self._forward_impl)
        self.forward_planar = jax.jit(self._planar_forward_impl)

    # ------------------------------------------------------------------ #
    # planar path: re/im in, re/im out — this is the kernel at its 16 B/elem
    # roofline with no wrapper-side complex split/repack traffic.
    # ------------------------------------------------------------------ #
    def _planar_forward_impl(self, xr, xi):
        shape = xr.shape
        xr = xr.astype(jnp.float32).reshape(-1)
        xi = xi.astype(jnp.float32).reshape(-1)
        n = xr.shape[0]

        n_cols = _N_COLS
        rows = pl.cdiv(n, n_cols)
        max_rows = self._max_tile_rows

        if rows > max_rows:
            # Many steps: balance tile size across an even number of steps so
            # dimension_semantics=("parallel",) splits evenly over 2 TCs (v7x).
            grid_n = pl.cdiv(rows, max_rows)
            if grid_n % 2:
                grid_n += 1
            tile_rows = _round_up(pl.cdiv(rows, grid_n), 8)
        elif rows >= 256:
            # Split in two only when each step still moves >= ~1 MiB of data.
            tile_rows = _round_up(pl.cdiv(rows, 2), 8)
        else:
            # Tiny input: one block, no forced split (grid steps cost ~0.35 us each).
            tile_rows = _round_up(max(rows, 1), 8)

        rows_pad = _round_up(rows, tile_rows)
        total_pad = rows_pad * n_cols
        if total_pad != n:
            # zero padding is safe: clamp -> amin, log/atan stay finite; sliced off below.
            xr = jnp.pad(xr, (0, total_pad - n))
            xi = jnp.pad(xi, (0, total_pad - n))
        xr = xr.reshape(rows_pad, n_cols)
        xi = xi.reshape(rows_pad, n_cols)
        grid = rows_pad // tile_rows

        inv_ln10 = 1.0 / math.log(10.0)
        kernel = partial(
            _cplx_amp_to_db_kernel,
            amin=float(self.amin),
            c_log=float(self.multiplier) * 0.5 * inv_ln10,
            c_phase=float(self.multiplier) * inv_ln10,
            db_offset=float(self.multiplier) * float(self.db_multiplier),
        )

        blk = pl.BlockSpec((tile_rows, n_cols), lambda i: (i, 0))
        footprint = 8 * tile_rows * n_cols * 4  # 4 planes x 2 buffers, f32
        cost = pl.CostEstimate(
            flops=22 * total_pad,            # ~22 VALU ops / element after fusion
            transcendentals=2 * total_pad,   # one log + one divide per element
            bytes_accessed=16 * total_pad,   # 8 B in + 8 B out per element
        )

        out_re, out_im = pl.pallas_call(
            kernel,
            out_shape=(
                jax.ShapeDtypeStruct((rows_pad, n_cols), jnp.float32),
                jax.ShapeDtypeStruct((rows_pad, n_cols), jnp.float32),
            ),
            grid=(grid,),
            in_specs=[blk, blk],
            out_specs=(blk, blk),
            compiler_params=pltpu.CompilerParams(
                dimension_semantics=("parallel",),
                vmem_limit_bytes=int(max(32 << 20, footprint + (8 << 20))),
            ),
            cost_estimate=cost,
        )(xr, xi)

        out_re = out_re.reshape(-1)[:n].reshape(shape)
        out_im = out_im.reshape(-1)[:n].reshape(shape)
        return out_re, out_im

    # ------------------------------------------------------------------ #
    # spec-faithful complex path
    # ------------------------------------------------------------------ #
    def _forward_impl(self, x):
        x = jnp.asarray(x)
        if not jnp.issubdtype(x.dtype, jnp.complexfloating):
            x = x.astype(jnp.complex64)
        # TODO(synk): no zero-copy complex64<->f32 reinterpret exists in XLA
        # (bitcast_convert rejects width-changing complex casts), so one fused
        # real/imag/pad pass in and one lax.complex repack pass out are the
        # minimum wrapper traffic for a complex boundary; use forward_planar()
        # from planar pipelines to avoid both.
        out_re, out_im = self._planar_forward_impl(jnp.real(x), jnp.imag(x))
        return jax.lax.complex(out_re, out_im)

    def __call__(self, x):
        return self._forward(x)


# ----------------------------------------------------------------------------
# pure-JAX reference (faithful to torch: clamp re/im, complex log10 * mult,
# subtract the real-valued multiplier*db_multiplier from the real part)
# ----------------------------------------------------------------------------
def _reference(mod: CplxAmplitudeToDBPallas, x: jnp.ndarray) -> jnp.ndarray:
    xr = jnp.maximum(jnp.real(x).astype(jnp.float32), mod.amin)
    xi = jnp.maximum(jnp.imag(x).astype(jnp.float32), mod.amin)
    out_re = (mod.multiplier * 0.5 * jnp.log10(xr * xr + xi * xi)
              - mod.multiplier * mod.db_multiplier)
    out_im = mod.multiplier * jnp.arctan2(xi, xr) / math.log(10.0)
    return jax.lax.complex(out_re, out_im)


if __name__ == "__main__":
    key = jax.random.PRNGKey(0)
    k1, k2 = jax.random.split(key)
    # complex spectrogram-like input: (batch=2, channels=4, n_freq=129, n_frames=16)
    shape = (2, 4, 129, 16)
    xr = jax.random.normal(k1, shape, dtype=jnp.float32)
    xi = jax.random.normal(k2, shape, dtype=jnp.float32)
    x = jax.lax.complex(xr, xi)

    mod = CplxAmplitudeToDBPallas(stype="power")
    out = jax.block_until_ready(mod(x))

    ref = _reference(mod, x)
    assert out.shape == ref.shape and out.dtype == jnp.complex64, (out.shape, out.dtype)
    np.testing.assert_allclose(np.asarray(out.real), np.asarray(ref.real),
                               rtol=2e-4, atol=2e-3)
    np.testing.assert_allclose(np.asarray(out.imag), np.asarray(ref.imag),
                               rtol=2e-4, atol=2e-3)

    # planar entry point (roofline path, no complex split/repack) — same math
    pr, pi = jax.block_until_ready(mod.forward_planar(xr, xi))
    np.testing.assert_allclose(np.asarray(pr), np.asarray(ref.real),
                               rtol=2e-4, atol=2e-3)
    np.testing.assert_allclose(np.asarray(pi), np.asarray(ref.imag),
                               rtol=2e-4, atol=2e-3)
    print("KERNEL_OK")
</pallas_src>

<mosaic_0001>
module attributes {stable_mosaic.version = 11 : i64} {
  func.func @_cplx_amp_to_db_kernel(%arg0: i32, %arg1: memref<40x512xf32, #tpu.memory_space<vmem>>, %arg2: memref<40x512xf32, #tpu.memory_space<vmem>>, %arg3: memref<40x512xf32, #tpu.memory_space<vmem>>, %arg4: memref<40x512xf32, #tpu.memory_space<vmem>>) attributes {dimension_semantics = [#tpu.dimension_semantics<parallel>], iteration_bounds = array<i64: 1>, scalar_prefetch = 0 : i64, scratch_operands = 0 : i64, tpu.core_type = #tpu.core_type<tc>, window_params = [{transform_indices = @transform_0, window_bounds = array<i64: 40, 512>}, {transform_indices = @transform_1, window_bounds = array<i64: 40, 512>}, {transform_indices = @transform_2, window_bounds = array<i64: 40, 512>}, {transform_indices = @transform_3, window_bounds = array<i64: 40, 512>}]} {
    %c0 = arith.constant 0 : index
    %c0_0 = arith.constant 0 : index
    %0 = vector.load %arg1[%c0, %c0_0] : memref<40x512xf32, #tpu.memory_space<vmem>>, vector<40x512xf32>
    %cst = arith.constant 1.000000e-10 : f32
    %1 = vector.broadcast %cst : f32 to vector<40x512xf32>
    %2 = arith.maximumf %0, %1 : vector<40x512xf32>
    %c0_1 = arith.constant 0 : index
    %c0_2 = arith.constant 0 : index
    %3 = vector.load %arg2[%c0_1, %c0_2] : memref<40x512xf32, #tpu.memory_space<vmem>>, vector<40x512xf32>
    %cst_3 = arith.constant 1.000000e-10 : f32
    %4 = vector.broadcast %cst_3 : f32 to vector<40x512xf32>
    %5 = arith.maximumf %3, %4 : vector<40x512xf32>
    %6 = arith.mulf %2, %2 : vector<40x512xf32>
    %7 = arith.mulf %5, %5 : vector<40x512xf32>
    %8 = arith.addf %6, %7 : vector<40x512xf32>
    %9 = math.log %8 : vector<40x512xf32>
    %cst_4 = arith.constant 2.17147231 : f32
    %10 = vector.broadcast %cst_4 : f32 to vector<40x512xf32>
    %11 = arith.mulf %10, %9 : vector<40x512xf32>
    %cst_5 = arith.constant 0.000000e+00 : f32
    %12 = vector.broadcast %cst_5 : f32 to vector<40x512xf32>
    %13 = arith.subf %11, %12 : vector<40x512xf32>
    %c0_6 = arith.constant 0 : index
    %c0_7 = arith.constant 0 : index
    %14 = vector.load %arg3[%c0_6, %c0_7] : memref<40x512xf32, #tpu.memory_space<vmem>>, vector<40x512xf32>
    tpu.vector_store %arg3[%c0_6, %c0_7], %13 {strides = array<i32>} : memref<40x512xf32, #tpu.memory_space<vmem>>, vector<40x512xf32>,
    %15 = arith.minimumf %5, %2 : vector<40x512xf32>
    %16 = arith.maximumf %5, %2 : vector<40x512xf32>
    %cst_8 = arith.constant 0.414213568 : f32
    %17 = vector.broadcast %cst_8 : f32 to vector<40x512xf32>
    %18 = arith.mulf %17, %16 : vector<40x512xf32>
    %19 = arith.cmpf ogt, %15, %18 : vector<40x512xf32>
    %20 = arith.subf %15, %16 : vector<40x512xf32>
    %21 = arith.select %19, %20, %15 : vector<40x512xi1>, vector<40x512xf32>
    %22 = arith.addf %15, %16 : vector<40x512xf32>
    %23 = arith.select %19, %22, %16 : vector<40x512xi1>, vector<40x512xf32>
    %24 = arith.divf %21, %23 : vector<40x512xf32>
    %25 = arith.mulf %24, %24 : vector<40x512xf32>
    %cst_9 = arith.constant 0.0805374458 : f32
    %26 = vector.broadcast %cst_9 : f32 to vector<40x512xf32>
    %27 = arith.mulf %26, %25 : vector<40x512xf32>
    %cst_10 = arith.constant 0.138776854 : f32
    %28 = vector.broadcast %cst_10 : f32 to vector<40x512xf32>
    %29 = arith.subf %27, %28 : vector<40x512xf32>
    %30 = arith.mulf %29, %25 : vector<40x512xf32>
    %cst_11 = arith.constant 0.199777111 : f32
    %31 = vector.broadcast %cst_11 : f32 to vector<40x512xf32>
    %32 = arith.addf %30, %31 : vector<40x512xf32>
    %33 = arith.mulf %32, %25 : vector<40x512xf32>
    %cst_12 = arith.constant 0.333329499 : f32
    %34 = vector.broadcast %cst_12 : f32 to vector<40x512xf32>
    %35 = arith.subf %33, %34 : vector<40x512xf32>
    %36 = arith.mulf %24, %25 : vector<40x512xf32>
    %37 = arith.mulf %36, %35 : vector<40x512xf32>
    %38 = arith.addf %24, %37 : vector<40x512xf32>
    %cst_13 = arith.constant 0.785398185 : f32
    %39 = vector.broadcast %cst_13 : f32 to vector<40x512xf32>
    %40 = arith.addf %39, %38 : vector<40x512xf32>
    %41 = arith.select %19, %40, %38 : vector<40x512xi1>, vector<40x512xf32>
    %42 = arith.cmpf ogt, %5, %2 : vector<40x512xf32>
    %cst_14 = arith.constant 1.57079637 : f32
    %43 = vector.broadcast %cst_14 : f32 to vector<40x512xf32>
    %44 = arith.subf %43, %41 : vector<40x512xf32>
    %45 = arith.select %42, %44, %41 : vector<40x512xi1>, vector<40x512xf32>
    %cst_15 = arith.constant 4.34294462 : f32
    %46 = vector.broadcast %cst_15 : f32 to vector<40x512xf32>
    %47 = arith.mulf %46, %45 : vector<40x512xf32>
    %c0_16 = arith.constant 0 : index
    %c0_17 = arith.constant 0 : index
    %48 = vector.load %arg4[%c0_16, %c0_17] : memref<40x512xf32, #tpu.memory_space<vmem>>, vector<40x512xf32>
    tpu.vector_store %arg4[%c0_16, %c0_17], %47 {strides = array<i32>} : memref<40x512xf32, #tpu.memory_space<vmem>>, vector<40x512xf32>,
    return
  }
  func.func @transform_0(%arg0: i32) -> (i32, i32) {
    %c0_i32 = arith.constant 0 : i32
    %c0_i32_0 = arith.constant 0 : i32
    return %arg0, %c0_i32 : i32, i32
  }
  func.func @transform_1(%arg0: i32) -> (i32, i32) {
    %c0_i32 = arith.constant 0 : i32
    %c0_i32_0 = arith.constant 0 : i32
    return %arg0, %c0_i32 : i32, i32
  }
  func.func @transform_2(%arg0: i32) -> (i32, i32) {
    %c0_i32 = arith.constant 0 : i32
    %c0_i32_0 = arith.constant 0 : i32
    return %arg0, %c0_i32 : i32, i32
  }
  func.func @transform_3(%arg0: i32) -> (i32, i32) {
    %c0_i32 = arith.constant 0 : i32
    %c0_i32_0 = arith.constant 0 : i32
    return %arg0, %c0_i32 : i32, i32
  }
}

</mosaic_0001>

<bundles_post_ra>
// kernel: custom-call.1
= control target key start
LH: loop header
LB: loop body
LE: loop exit
PB: predicated region body
PF: predicated region fallthrough
CT: control target
= control target key end

     0   :  { %s59_s0 = inlined_call_operand.hbm [shape: c64[2,4,129,16], index: 0, kind: input, shape index: {}]   ;;  %s60_s1 = inlined_call_operand.vmem [shape: f32[2,4,129,16], index: 1, kind: output, shape index: {}]  }
   0x1   :  { %s2_s8 = scalar_lea.hbm %s59_s0, 4096 }
   0x2   :  { %3 = vsyncpa [#allocation0], 0  ;;  %s4_s11 = sshll.u32 %s60_s1, 4  ;;  %s34_s14 = scalar_lea.hbm %s59_s0, 8192  ;;  %s5_s11 = int_to_ptr.vmem [resolvable:$true] %s4_s11 }
   0x3   :  { %p11_p0 = scmp.ne.s32.totalorder %s2_s8, %s34_s14  ;;  %p13_p1 = scmp.lt.u32.totalorder %s2_s8, %s59_s0 }
   0x4   :  { %p14_p2 = scmp.lt.u32.totalorder %s34_s14, %s34_s14  ;;  %p16_p4 = scmp.lt.u32.totalorder %s34_s14, %s2_s8 }
   0x6   :  { %p15_p3 = por %p14_p2, %p13_p1 }
   0x8   :  { %p17_p5 = por %p16_p4, %p15_p3 }
   0xa   :  { %p18_p6 = pnand %p17_p5, %p11_p0 }
   0xc   :  { %21 = shalt.err (!%p18_p6)  }
   0xd   :  { %s22_s17 = scalar_lea.vmem %s5_s11, 4096  ;;  %p27_p8 = scmp.lt.s32.totalorder %s5_s11, %s5_s11 }
   0xe   :  { %p23_p7 = scmp.ne.s32.totalorder %s5_s11, %s22_s17  ;;  %p28_p9 = scmp.lt.s32.totalorder %s22_s17, %s22_s17 }
  0x10   :  { %p29_p10 = por %p28_p9, %p27_p8 }
  0x12   :  { %p30_p11 = pnand %p29_p10, %p23_p7 }
  0x14   :  { %33 = shalt.err (!%p30_p11)  }
  0x15   :  { %7 = dma.hbm_to_vmem [thread:$0]  %s2_s8, 4096, %s5_s11, [#allocation0] }
  0x16   :  { %35 = dma.done.wait [#allocation0], 4096  }
  0x17   :  { %36 = vsyncadd [#allocation0], 4294963200 }
  0x18   :  { %9 = vsyncpa [#allocation0], 1 }

// kernel: custom-call
= control target key start
LH: loop header
LB: loop body
LE: loop exit
PB: predicated region body
PF: predicated region fallthrough
CT: control target
= control target key end

     0   :  { %2 = vsyncpa [#allocation0], 0  ;;  %s61_s0 = inlined_call_operand.hbm [shape: c64[2,4,129,16], index: 0, kind: input, shape index: {}]   ;;  %s62_s1 = inlined_call_operand.vmem [shape: f32[2,4,129,16], index: 1, kind: output, shape index: {}]  }
   0x1   :  { %s3_s8 = sshll.u32 %s62_s1, 4  ;;  %s9_s11 = scalar_lea.hbm %s61_s0, 4096  ;;  %s4_s8 = int_to_ptr.vmem [resolvable:$true] %s3_s8 }
   0x2   :  { %p10_p0 = scmp.ne.s32.totalorder %s61_s0, %s9_s11  ;;  %s11_s16 = scalar_lea.hbm %s61_s0, 8192 }
   0x3   :  { %p12_p1 = scmp.lt.u32.totalorder %s11_s16, %s9_s11  ;;  %p13_p2 = scmp.lt.u32.totalorder %s9_s11, %s61_s0 }
   0x5   :  { %p14_p3 = por %p13_p2, %p12_p1 }
   0x7   :  { %p15_p4 = pnand %p14_p3, %p10_p0 }
   0x9   :  { %18 = shalt.err (!%p15_p4)  }
   0xa   :  { %s19_s1 = scalar_lea.vmem %s4_s8, 4096  ;;  %p24_p6 = scmp.lt.s32.totalorder %s4_s8, %s4_s8 }
   0xb   :  { %p20_p5 = scmp.ne.s32.totalorder %s4_s8, %s19_s1  ;;  %p25_p7 = scmp.lt.s32.totalorder %s19_s1, %s19_s1 }
   0xd   :  { %p26_p8 = por %p25_p7, %p24_p6 }
   0xf   :  { %p27_p9 = pnand %p26_p8, %p20_p5 }
  0x11   :  { %30 = shalt.err (!%p27_p9)  }
  0x12   :  { %6 = dma.hbm_to_vmem [thread:$0]  %s61_s0, 4096, %s4_s8, [#allocation0] }
  0x13   :  { %31 = dma.done.wait [#allocation0], 4096  }
  0x14   :  { %32 = vsyncadd [#allocation0], 4294963200 }
  0x15   :  { %8 = vsyncpa [#allocation0], 1 }

// kernel: custom-call.2
= control target key start
LH: loop header
LB: loop body
LE: loop exit
PB: predicated region body
PF: predicated region fallthrough
CT: control target
= control target key end

     0   :  { %s3412_s0 = inlined_call_operand.vmem [shape: f32[2,4,129,16], index: 0, kind: input, shape index: {}]   ;;  %s3413_s2 = inlined_call_operand.vmem [shape: c64[2,4,129,16], index: 2, kind: output, shape index: {}]   ;;  %s3414_s1 = inlined_call_operand.vmem [shape: f32[2,4,129,16], index: 1, kind: input, shape index: {}]  }
   0x1   :  { %v5_v0 = vld [vmem:[%s3412_s0] sm:$0xff]  ;;  %v1224_v1 = vld [vmem:[%s3412_s0 + $0x8] sm:$0xff]  ;;  %v1226_v2 = vld [vmem:[%s3412_s0 + $0x10] sm:$0xff] }
   0x2   :  { %6 = vst [vmem:[%s3413_s2] sm:$0xff] %v5_v0  ;;  %1225 = vst [vmem:[%s3413_s2 + $0x8] sm:$0xff] %v1224_v1  ;;  %v1228_v3 = vld [vmem:[%s3412_s0 + $0x18] sm:$0xff]  ;;  %v1230_v4 = vld [vmem:[%s3412_s0 + $0x20] sm:$0xff] }
   0x3   :  { %1227 = vst [vmem:[%s3413_s2 + $0x10] sm:$0xff] %v1226_v2  ;;  %v1232_v5 = vld [vmem:[%s3412_s0 + $0x28] sm:$0xff]  ;;  %1229 = vst [vmem:[%s3413_s2 + $0x18] sm:$0xff] %v1228_v3  ;;  %v1234_v6 = vld [vmem:[%s3412_s0 + $0x30] sm:$0xff] }
   0x4   :  { %1231 = vst [vmem:[%s3413_s2 + $0x20] sm:$0xff] %v1230_v4  ;;  %1233 = vst [vmem:[%s3413_s2 + $0x28] sm:$0xff] %v1232_v5  ;;  %v1236_v7 = vld [vmem:[%s3412_s0 + $0x38] sm:$0xff]  ;;  %v1238_v8 = vld [vmem:[%s3412_s0 + $0x40] sm:$0xff] }
   0x5   :  { %1235 = vst [vmem:[%s3413_s2 + $0x30] sm:$0xff] %v1234_v6  ;;  %1237 = vst [vmem:[%s3413_s2 + $0x38] sm:$0xff] %v1236_v7  ;;  %v1240_v9 = vld [vmem:[%s3412_s0 + $0x48] sm:$0xff]  ;;  %v1242_v10 = vld [vmem:[%s3412_s0 + $0x50] sm:$0xff] }
   0x6   :  { %1239 = vst [vmem:[%s3413_s2 + $0x40] sm:$0xff] %v1238_v8  ;;  %v1244_v11 = vld [vmem:[%s3412_s0 + $0x58] sm:$0xff]  ;;  %1241 = vst [vmem:[%s3413_s2 + $0x48] sm:$0xff] %v1240_v9  ;;  %v1246_v12 = vld [vmem:[%s3412_s0 + $0x60] sm:$0xff] }
   0x7   :  { %1243 = vst [vmem:[%s3413_s2 + $0x50] sm:$0xff] %v1242_v10  ;;  %1245 = vst [vmem:[%s3413_s2 + $0x58] sm:$0xff] %v1244_v11  ;;  %v1248_v13 = vld [vmem:[%s3412_s0 + $0x68] sm:$0xff]  ;;  %v1250_v14 = vld [vmem:[%s3412_s0 + $0x70] sm:$0xff] }
   0x8   :  { %1247 = vst [vmem:[%s3413_s2 + $0x60] sm:$0xff] %v1246_v12  ;;  %1249 = vst [vmem:[%s3413_s2 + $0x68] sm:$0xff] %v1248_v13  ;;  %v1252_v15 = vld [vmem:[%s3412_s0 + $0x78] sm:$0xff]  ;;  %v1254_v16 = vld [vmem:[%s3412_s0 + $0x80] sm:$0xff] }
   0x9   :  { %1251 = vst [vmem:[%s3413_s2 + $0x70] sm:$0xff] %v1250_v14  ;;  %v1256_v17 = vld [vmem:[%s3412_s0 + $0x88] sm:$0xff]  ;;  %1253 = vst [vmem:[%s3413_s2 + $0x78] sm:$0xff] %v1252_v15  ;;  %v1258_v18 = vld [vmem:[%s3412_s0 + $0x90] sm:$0xff] }
   0xa   :  { %1255 = vst [vmem:[%s3413_s2 + $0x80] sm:$0xff] %v1254_v16  ;;  %1257 = vst [vmem:[%s3413_s2 + $0x88] sm:$0xff] %v1256_v17  ;;  %v1260_v19 = vld [vmem:[%s3412_s0 + $0x98] sm:$0xff]  ;;  %v1262_v20 = vld [vmem:[%s3412_s0 + $0xa0] sm:$0xff] }
   0xb   :  { %1259 = vst [vmem:[%s3413_s2 + $0x90] sm:$0xff] %v1258_v18  ;;  %1261 = vst [vmem:[%s3413_s2 + $0x98] sm:$0xff] %v1260_v19  ;;  %v1264_v21 = vld [vmem:[%s3412_s0 + $0xa8] sm:$0xff]  ;;  %v1266_v22 = vld [vmem:[%s3412_s0 + $0xb0] sm:$0xff] }
   0xc   :  { %1263 = vst [vmem:[%s3413_s2 + $0xa0] sm:$0xff] %v1262_v20  ;;  %v1268_v23 = vld [vmem:[%s3412_s0 + $0xb8] sm:$0xff]  ;;  %1265 = vst [vmem:[%s3413_s2 + $0xa8] sm:$0xff] %v1264_v21  ;;  %v1270_v24 = vld [vmem:[%s3412_s0 + $0xc0] sm:$0xff] }
   0xd   :  { %1267 = vst [vmem:[%s3413_s2 + $0xb0] sm:$0xff] %v1266_v22  ;;  %1269 = vst [vmem:[%s3413_s2 + $0xb8] sm:$0xff] %v1268_v23  ;;  %v1272_v25 = vld [vmem:[%s3412_s0 + $0xc8] sm:$0xff]  ;;  %v1274_v26 = vld [vmem:[%s3412_s0 + $0xd0] sm:$0xff] }
   0xe   :  { %1271 = vst [vmem:[%s3413_s2 + $0xc0] sm:$0xff] %v1270_v24  ;;  %1273 = vst [vmem:[%s3413_s2 + $0xc8] sm:$0xff] %v1272_v25  ;;  %v1276_v27 = vld [vmem:[%s3412_s0 + $0xd8] sm:$0xff]  ;;  %v1278_v28 = vld [vmem:[%s3412_s0 + $0xe0] sm:$0xff] }
   0xf   :  { %1275 = vst [vmem:[%s3413_s2 + $0xd0] sm:$0xff] %v1274_v26  ;;  %v1280_v29 = vld [vmem:[%s3412_s0 + $0xe8] sm:$0xff]  ;;  %1277 = vst [vmem:[%s3413_s2 + $0xd8] sm:$0xff] %v1276_v27  ;;  %v1282_v30 = vld [vmem:[%s3412_s0 + $0xf0] sm:$0xff] }
  0x10   :  { %1279 = vst [vmem:[%s3413_s2 + $0xe0] sm:$0xff] %v1278_v28  ;;  %1281 = vst [vmem:[%s3413_s2 + $0xe8] sm:$0xff] %v1280_v29  ;;  %v1284_v31 = vld [vmem:[%s3412_s0 + $0xf8] sm:$0xff]  ;;  %v1286_v32 = vld [vmem:[%s3412_s0 + $0x100] sm:$0xff] }
  0x11   :  { %1283 = vst [vmem:[%s3413_s2 + $0xf0] sm:$0xff] %v1282_v30  ;;  %1285 = vst [vmem:[%s3413_s2 + $0xf8] sm:$0xff] %v1284_v31  ;;  %v1288_v33 = vld [vmem:[%s3412_s0 + $0x108] sm:$0xff]  ;;  %v1290_v34 = vld [vmem:[%s3412_s0 + $0x110] sm:$0xff] }
  0x12   :  { %1287 = vst [vmem:[%s3413_s2 + $0x100] sm:$0xff] %v1286_v32  ;;  %v1292_v35 = vld [vmem:[%s3412_s0 + $0x118] sm:$0xff]  ;;  %1289 = vst [vmem:[%s3413_s2 + $0x108] sm:$0xff] %v1288_v33  ;;  %v1294_v36 = vld [vmem:[%s3412_s0 + $0x120] sm:$0xff] }
  0x13   :  { %1291 = vst [vmem:[%s3413_s2 + $0x110] sm:$0xff] %v1290_v34  ;;  %1293 = vst [vmem:[%s3413_s2 + $0x118] sm:$0xff] %v1292_v35  ;;  %v1296_v37 = vld [vmem:[%s3412_s0 + $0x128] sm:$0xff]  ;;  %v1298_v38 = vld [vmem:[%s3412_s0 + $0x130] sm:$0xff] }
  0x14   :  { %1295 = vst [vmem:[%s3413_s2 + $0x120] sm:$0xff] %v1294_v36  ;;  %1297 = vst [vmem:[%s3413_s2 + $0x128] sm:$0xff] %v1296_v37  ;;  %v1300_v39 = vld [vmem:[%s3412_s0 + $0x138] sm:$0xff]  ;;  %v1302_v40 = vld [vmem:[%s3412_s0 + $0x140] sm:$0xff] }
  0x15   :  { %1299 = vst [vmem:[%s3413_s2 + $0x130] sm:$0xff] %v1298_v38  ;;  %v1304_v41 = vld [vmem:[%s3412_s0 + $0x148] sm:$0xff]  ;;  %1301 = vst [vmem:[%s3413_s2 + $0x138] sm:$0xff] %v1300_v39  ;;  %v1306_v42 = vld [vmem:[%s3412_s0 + $0x150] sm:$0xff] }
  0x16   :  { %1303 = vst [vmem:[%s3413_s2 + $0x140] sm:$0xff] %v1302_v40  ;;  %1305 = vst [vmem:[%s3413_s2 + $0x148] sm:$0xff] %v1304_v41  ;;  %v1308_v43 = vld [vmem:[%s3412_s0 + $0x158] sm:$0xff]  ;;  %v1310_v44 = vld [vmem:[%s3412_s0 + $0x160] sm:$0xff] }
  0x17   :  { %1307 = vst [vmem:[%s3413_s2 + $0x150] sm:$0xff] %v1306_v42  ;;  %1309 = vst [vmem:[%s3413_s2 + $0x158] sm:$0xff] %v1308_v43  ;;  %v1312_v45 = vld [vmem:[%s3412_s0 + $0x168] sm:$0xff]  ;;  %v1314_v46 = vld [vmem:[%s3412_s0 + $0x170] sm:$0xff] }
  0x18   :  { %1311 = vst [vmem:[%s3413_s2 + $0x160] sm:$0xff] %v1310_v44  ;;  %v1316_v47 = vld [vmem:[%s3412_s0 + $0x178] sm:$0xff]  ;;  %1313 = vst [vmem:[%s3413_s2 + $0x168] sm:$0xff] %v1312_v45  ;;  %v1318_v48 = vld [vmem:[%s3412_s0 + $0x180] sm:$0xff] }
  0x19   :  { %1315 = vst [vmem:[%s3413_s2 + $0x170] sm:$0xff] %v1314_v46  ;;  %1317 = vst [vmem:[%s3413_s2 + $0x178] sm:$0xff] %v1316_v47  ;;  %v1320_v49 = vld [vmem:[%s3412_s0 + $0x188] sm:$0xff]  ;;  %v1322_v50 = vld [vmem:[%s3412_s0 + $0x190] sm:$0xff] }
  0x1a   :  { %1319 = vst [vmem:[%s3413_s2 + $0x180] sm:$0xff] %v1318_v48  ;;  %1321 = vst [vmem:[%s3413_s2 + $0x188] sm:$0xff] %v1320_v49  ;;  %v1324_v51 = vld [vmem:[%s3412_s0 + $0x198] sm:$0xff]  ;;  %v1326_v52 = vld [vmem:[%s3412_s0 + $0x1a0] sm:$0xff] }
  0x1b   :  { %1323 = vst [vmem:[%s3413_s2 + $0x190] sm:$0xff] %v1322_v50  ;;  %v1328_v53 = vld [vmem:[%s3412_s0 + $0x1a8] sm:$0xff]  ;;  %1325 = vst [vmem:[%s3413_s2 + $0x198] sm:$0xff] %v1324_v51  ;;  %v1330_v54 = vld [vmem:[%s3412_s0 + $0x1b0] sm:$0xff] }
  0x1c   :  { %1327 = vst [vmem:[%s3413_s2 + $0x1a0] sm:$0xff] %v1326_v52  ;;  %1329 = vst [vmem:[%s3413_s2 + $0x1a8] sm:$0xff] %v1328_v53  ;;  %v1332_v55 = vld [vmem:[%s3412_s0 + $0x1b8] sm:$0xff]  ;;  %v1334_v56 = vld [vmem:[%s3412_s0 + $0x1c0] sm:$0xff] }
  0x1d   :  { %1331 = vst [vmem:[%s3413_s2 + $0x1b0] sm:$0xff] %v1330_v54  ;;  %1333 = vst [vmem:[%s3413_s2 + $0x1b8] sm:$0xff] %v1332_v55  ;;  %v1336_v57 = vld [vmem:[%s3412_s0 + $0x1c8] sm:$0xff]  ;;  %v1338_v58 = vld [vmem:[%s3412_s0 + $0x1d0] sm:$0xff] }
  0x1e   :  { %1335 = vst [vmem:[%s3413_s2 + $0x1c0] sm:$0xff] %v1334_v56  ;;  %v1340_v59 = vld [vmem:[%s3412_s0 + $0x1d8] sm:$0xff]  ;;  %1337 = vst [vmem:[%s3413_s2 + $0x1c8] sm:$0xff] %v1336_v57  ;;  %v1342_v60 = vld [vmem:[%s3412_s0 + $0x1e0] sm:$0xff] }
  0x1f   :  { %1339 = vst [vmem:[%s3413_s2 + $0x1d0] sm:$0xff] %v1338_v58  ;;  %1341 = vst [vmem:[%s3413_s2 + $0x1d8] sm:$0xff] %v1340_v59  ;;  %v1344_v61 = vld [vmem:[%s3412_s0 + $0x1e8] sm:$0xff]  ;;  %v1346_v62 = vld [vmem:[%s3412_s0 + $0x1f0] sm:$0xff] }
  0x20   :  { %1343 = vst [vmem:[%s3413_s2 + $0x1e0] sm:$0xff] %v1342_v60  ;;  %1345 = vst [vmem:[%s3413_s2 + $0x1e8] sm:$0xff] %v1344_v61  ;;  %v1348_v63 = vld [vmem:[%s3412_s0 + $0x1f8] sm:$0xff]  ;;  %v1350_v0 = vld [vmem:[%s3412_s0 + $0x200] sm:$0xff] }
  0x21   :  { %1347 = vst [vmem:[%s3413_s2 + $0x1f0] sm:$0xff] %v1346_v62  ;;  %v1352_v1 = vld [vmem:[%s3412_s0 + $0x208] sm:$0xff]  ;;  %1349 = vst [vmem:[%s3413_s2 + $0x1f8] sm:$0xff] %v1348_v63  ;;  %v1354_v2 = vld [vmem:[%s3412_s0 + $0x210] sm:$0xff] }
  0x22   :  { %1351 = vst [vmem:[%s3413_s2 + $0x200] sm:$0xff] %v1350_v0  ;;  %1353 = vst [vmem:[%s3413_s2 + $0x208] sm:$0xff] %v1352_v1  ;;  %v1356_v3 = vld [vmem:[%s3412_s0 + $0x218] sm:$0xff]  ;;  %v1358_v4 = vld [vmem:[%s3412_s0 + $0x220] sm:$0xff] }
  0x23   :  { %1355 = vst [vmem:[%s3413_s2 + $0x210] sm:$0xff] %v1354_v2  ;;  %1357 = vst [vmem:[%s3413_s2 + $0x218] sm:$0xff] %v1356_v3  ;;  %v1360_v5 = vld [vmem:[%s3412_s0 + $0x228] sm:$0xff]  ;;  %v1362_v6 = vld [vmem:[%s3412_s0 + $0x230] sm:$0xff] }
  0x24   :  { %1359 = vst [vmem:[%s3413_s2 + $0x220] sm:$0xff] %v1358_v4  ;;  %v1364_v7 = vld [vmem:[%s3412_s0 + $0x238] sm:$0xff]  ;;  %1361 = vst [vmem:[%s3413_s2 + $0x228] sm:$0xff] %v1360_v5  ;;  %v1366_v8 = vld [vmem:[%s3412_s0 + $0x240] sm:$0xff] }
  0x25   :  { %1363 = vst [vmem:[%s3413_s2 + $0x230] sm:$0xff] %v1362_v6  ;;  %1365 = vst [vmem:[%s3413_s2 + $0x238] sm:$0xff] %v1364_v7  ;;  %v1368_v9 = vld [vmem:[%s3412_s0 + $0x248] sm:$0xff]  ;;  %v1370_v10 = vld [vmem:[%s3412_s0 + $0x250] sm:$0xff] }
  0x26   :  { %1367 = vst [vmem:[%s3413_s2 + $0x240] sm:$0xff] %v1366_v8  ;;  %1369 = vst [vmem:[%s3413_s2 + $0x248] sm:$0xff] %v1368_v9  ;;  %v1372_v11 = vld [vmem:[%s3412_s0 + $0x258] sm:$0xff]  ;;  %v1374_v12 = vld [vmem:[%s3412_s0 + $0x260] sm:$0xff] }
  0x27   :  { %1371 = vst [vmem:[%s3413_s2 + $0x250] sm:$0xff] %v1370_v10  ;;  %v1376_v13 = vld [vmem:[%s3412_s0 + $0x268] sm:$0xff]  ;;  %1373 = vst [vmem:[%s3413_s2 + $0x258] sm:$0xff] %v1372_v11  ;;  %v1378_v14 = vld [vmem:[%s3412_s0 + $0x270] sm:$0xff] }
  0x28   :  { %1375 = vst [vmem:[%s3413_s2 + $0x260] sm:$0xff] %v1374_v12  ;;  %1377 = vst [vmem:[%s3413_s2 + $0x268] sm:$0xff] %v1376_v13  ;;  %v1380_v15 = vld [vmem:[%s3412_s0 + $0x278] sm:$0xff]  ;;  %v1382_v16 = vld [vmem:[%s3412_s0 + $0x280] sm:$0xff] }
  0x29   :  { %1379 = vst [vmem:[%s3413_s2 + $0x270] sm:$0xff] %v1378_v14  ;;  %1381 = vst [vmem:[%s3413_s2 + $0x278] sm:$0xff] %v1380_v15  ;;  %v1384_v17 = vld [vmem:[%s3412_s0 + $0x288] sm:$0xff]  ;;  %v1386_v18 = vld [vmem:[%s3412_s0 + $0x290] sm:$0xff] }
  0x2a   :  { %1383 = vst [vmem:[%s3413_s2 + $0x280] sm:$0xff] %v1382_v16  ;;  %v1388_v19 = vld [vmem:[%s3412_s0 + $0x298] sm:$0xff]  ;;  %1385 = vst [vmem:[%s3413_s2 + $0x288] sm:$0xff] %v1384_v17  ;;  %v1390_v20 = vld [vmem:[%s3412_s0 + $0x2a0] sm:$0xff] }
  0x2b   :  { %1387 = vst [vmem:[%s3413_s2 + $0x290] sm:$0xff] %v1386_v18  ;;  %1389 = vst [vmem:[%s3413_s2 + $0x298] sm:$0xff] %v1388_v19  ;;  %v1392_v21 = vld [vmem:[%s3412_s0 + $0x2a8] sm:$0xff]  ;;  %v1394_v22 = vld [vmem:[%s3412_s0 + $0x2b0] sm:$0xff] }
  0x2c   :  { %1391 = vst [vmem:[%s3413_s2 + $0x2a0] sm:$0xff] %v1390_v20  ;;  %1393 = vst [vmem:[%s3413_s2 + $0x2a8] sm:$0xff] %v1392_v21  ;;  %v1396_v23 = vld [vmem:[%s3412_s0 + $0x2b8] sm:$0xff]  ;;  %v1398_v24 = vld [vmem:[%s3412_s0 + $0x2c0] sm:$0xff] }
  0x2d   :  { %1395 = vst [vmem:[%s3413_s2 + $0x2b0] sm:$0xff] %v1394_v22  ;;  %v1400_v25 = vld [vmem:[%s3412_s0 + $0x2c8] sm:$0xff]  ;;  %1397 = vst [vmem:[%s3413_s2 + $0x2b8] sm:$0xff] %v1396_v23  ;;  %v1402_v26 = vld [vmem:[%s3412_s0 + $0x2d0] sm:$0xff] }
  0x2e   :  { %1399 = vst [vmem:[%s3413_s2 + $0x2c0] sm:$0xff] %v1398_v24  ;;  %1401 = vst [vmem:[%s3413_s2 + $0x2c8] sm:$0xff] %v1400_v25  ;;  %v1404_v27 = vld [vmem:[%s3412_s0 + $0x2d8] sm:$0xff]  ;;  %v1406_v28 = vld [vmem:[%s3412_s0 + $0x2e0] sm:$0xff] }
  0x2f   :  { %1403 = vst [vmem:[%s3413_s2 + $0x2d0] sm:$0xff] %v1402_v26  ;;  %1405 = vst [vmem:[%s3413_s2 + $0x2d8] sm:$0xff] %v1404_v27  ;;  %v1408_v29 = vld [vmem:[%s3412_s0 + $0x2e8] sm:$0xff]  ;;  %v1410_v30 = vld [vmem:[%s3412_s0 + $0x2f0] sm:$0xff] }
  0x30   :  { %1407 = vst [vmem:[%s3413_s2 + $0x2e0] sm:$0xff] %v1406_v28  ;;  %v1412_v31 = vld [vmem:[%s3412_s0 + $0x2f8] sm:$0xff]  ;;  %1409 = vst [vmem:[%s3413_s2 + $0x2e8] sm:$0xff] %v1408_v29  ;;  %v1414_v32 = vld [vmem:[%s3412_s0 + $0x300] sm:$0xff] }
  0x31   :  { %1411 = vst [vmem:[%s3413_s2 + $0x2f0] sm:$0xff] %v1410_v30  ;;  %1413 = vst [vmem:[%s3413_s2 + $0x2f8] sm:$0xff] %v1412_v31  ;;  %v1416_v33 = vld [vmem:[%s3412_s0 + $0x308] sm:$0xff]  ;;  %v1418_v34 = vld [vmem:[%s3412_s0 + $0x310] sm:$0xff] }
  0x32   :  { %1415 = vst [vmem:[%s3413_s2 + $0x300] sm:$0xff] %v1414_v32  ;;  %1417 = vst [vmem:[%s3413_s2 + $0x308] sm:$0xff] %v1416_v33  ;;  %v1420_v35 = vld [vmem:[%s3412_s0 + $0x318] sm:$0xff]  ;;  %v1422_v36 = vld [vmem:[%s3412_s0 + $0x320] sm:$0xff] }
  0x33   :  { %1419 = vst [vmem:[%s3413_s2 + $0x310] sm:$0xff] %v1418_v34  ;;  %v1424_v37 = vld [vmem:[%s3412_s0 + $0x328] sm:$0xff]  ;;  %1421 = vst [vmem:[%s3413_s2 + $0x318] sm:$0xff] %v1420_v35  ;;  %v1426_v38 = vld [vmem:[%s3412_s0 + $0x330] sm:$0xff] }
  0x34   :  { %1423 = vst [vmem:[%s3413_s2 + $0x320] sm:$0xff] %v1422_v36  ;;  %1425 = vst [vmem:[%s3413_s2 + $0x328] sm:$0xff] %v1424_v37  ;;  %v1428_v39 = vld [vmem:[%s3412_s0 + $0x338] sm:$0xff]  ;;  %v1430_v40 = vld [vmem:[%s3412_s0 + $0x340] sm:$0xff] }
  0x35   :  { %1427 = vst [vmem:[%s3413_s2 + $0x330] sm:$0xff] %v1426_v38  ;;  %1429 = vst [vmem:[%s3413_s2 + $0x338] sm:$0xff] %v1428_v39  ;;  %v1432_v41 = vld [vmem:[%s3412_s0 + $0x348] sm:$0xff]  ;;  %v1434_v42 = vld [vmem:[%s3412_s0 + $0x350] sm:$0xff] }
  0x36   :  { %1431 = vst [vmem:[%s3413_s2 + $0x340] sm:$0xff] %v1430_v40  ;;  %v1436_v43 = vld [vmem:[%s3412_s0 + $0x358] sm:$0xff]  ;;  %1433 = vst [vmem:[%s3413_s2 + $0x348] sm:$0xff] %v1432_v41  ;;  %v1438_v44 = vld [vmem:[%s3412_s0 + $0x360] sm:$0xff] }
  0x37   :  { %1435 = vst [vmem:[%s3413_s2 + $0x350] sm:$0xff] %v1434_v42  ;;  %1437 = vst [vmem:[%s3413_s2 + $0x358] sm:$0xff] %v1436_v43  ;;  %v1440_v45 = vld [vmem:[%s3412_s0 + $0x368] sm:$0xff]  ;;  %v1442_v46 = vld [vmem:[%s3412_s0 + $0x370] sm:$0xff] }
  0x38   :  { %1439 = vst [vmem:[%s3413_s2 + $0x360] sm:$0xff] %v1438_v44  ;;  %1441 = vst [vmem:[%s3413_s2 + $0x368] sm:$0xff] %v1440_v45  ;;  %v1444_v47 = vld [vmem:[%s3412_s0 + $0x378] sm:$0xff]  ;;  %v1446_v48 = vld [vmem:[%s3412_s0 + $0x380] sm:$0xff] }
  0x39   :  { %1443 = vst [vmem:[%s3413_s2 + $0x370] sm:$0xff] %v1442_v46  ;;  %v1448_v49 = vld [vmem:[%s3412_s0 + $0x388] sm:$0xff]  ;;  %1445 = vst [vmem:[%s3413_s2 + $0x378] sm:$0xff] %v1444_v47  ;;  %v1450_v50 = vld [vmem:[%s3412_s0 + $0x390] sm:$0xff] }
  0x3a   :  { %1447 = vst [vmem:[%s3413_s2 + $0x380] sm:$0xff] %v1446_v48  ;;  %1449 = vst [vmem:[%s3413_s2 + $0x388] sm:$0xff] %v1448_v49  ;;  %v1452_v51 = vld [vmem:[%s3412_s0 + $0x398] sm:$0xff]  ;;  %v1454_v52 = vld [vmem:[%s3412_s0 + $0x3a0] sm:$0xff] }
  0x3b   :  { %1451 = vst [vmem:[%s3413_s2 + $0x390] sm:$0xff] %v1450_v50  ;;  %1453 = vst [vmem:[%s3413_s2 + $0x398] sm:$0xff] %v1452_v51  ;;  %v1456_v53 = vld [vmem:[%s3412_s0 + $0x3a8] sm:$0xff]  ;;  %v1458_v54 = vld [vmem:[%s3412_s0 + $0x3b0] sm:$0xff] }
  0x3c   :  { %1455 = vst [vmem:[%s3413_s2 + $0x3a0] sm:$0xff] %v1454_v52  ;;  %v1460_v55 = vld [vmem:[%s3412_s0 + $0x3b8] sm:$0xff]  ;;  %1457 = vst [vmem:[%s3413_s2 + $0x3a8] sm:$0xff] %v1456_v53  ;;  %v1462_v56 = vld [vmem:[%s3412_s0 + $0x3c0] sm:$0xff] }
  0x3d   :  { %1459 = vst [vmem:[%s3413_s2 + $0x3b0] sm:$0xff] %v1458_v54  ;;  %1461 = vst [vmem:[%s3413_s2 + $0x3b8] sm:$0xff] %v1460_v55  ;;  %v1464_v57 = vld [vmem:[%s3412_s0 + $0x3c8] sm:$0xff]  ;;  %v1466_v58 = vld [vmem:[%s3412_s0 + $0x3d0] sm:$0xff] }
  0x3e   :  { %1463 = vst [vmem:[%s3413_s2 + $0x3c0] sm:$0xff] %v1462_v56  ;;  %1465 = vst [vmem:[%s3413_s2 + $0x3c8] sm:$0xff] %v1464_v57  ;;  %v1468_v59 = vld [vmem:[%s3412_s0 + $0x3d8] sm:$0xff]  ;;  %v1470_v60 = vld [vmem:[%s3412_s0 + $0x3e0] sm:$0xff] }
  0x3f   :  { %1467 = vst [vmem:[%s3413_s2 + $0x3d0] sm:$0xff] %v1466_v58  ;;  %v1472_v61 = vld [vmem:[%s3412_s0 + $0x3e8] sm:$0xff]  ;;  %1469 = vst [vmem:[%s3413_s2 + $0x3d8] sm:$0xff] %v1468_v59  ;;  %v1474_v62 = vld [vmem:[%s3412_s0 + $0x3f0] sm:$0xff] }
  0x40   :  { %1471 = vst [vmem:[%s3413_s2 + $0x3e0] sm:$0xff] %v1470_v60  ;;  %1473 = vst [vmem:[%s3413_s2 + $0x3e8] sm:$0xff] %v1472_v61  ;;  %v1476_v63 = vld [vmem:[%s3412_s0 + $0x3f8] sm:$0xff]  ;;  %v1478_v0 = vld [vmem:[%s3412_s0 + $0x400] sm:$0xff] }
  0x41   :  { %1475 = vst [vmem:[%s3413_s2 + $0x3f0] sm:$0xff] %v1474_v62  ;;  %1477 = vst [vmem:[%s3413_s2 + $0x3f8] sm:$0xff] %v1476_v63  ;;  %v1480_v1 = vld [vmem:[%s3412_s0 + $0x408] sm:$0xff]  ;;  %v1482_v2 = vld [vmem:[%s3412_s0 + $0x410] sm:$0xff] }
  0x42   :  { %1479 = vst [vmem:[%s3413_s2 + $0x400] sm:$0xff] %v1478_v0  ;;  %v1484_v3 = vld [vmem:[%s3412_s0 + $0x418] sm:$0xff]  ;;  %1481 = vst [vmem:[%s3413_s2 + $0x408] sm:$0xff] %v1480_v1  ;;  %v1486_v4 = vld [vmem:[%s3412_s0 + $0x420] sm:$0xff] }
  0x43   :  { %1483 = vst [vmem:[%s3413_s2 + $0x410] sm:$0xff] %v1482_v2  ;;  %1485 = vst [vmem:[%s3413_s2 + $0x418] sm:$0xff] %v1484_v3  ;;  %v1488_v5 = vld [vmem:[%s3412_s0 + $0x428] sm:$0xff]  ;;  %v1490_v6 = vld [vmem:[%s3412_s0 + $0x430] sm:$0xff] }
  0x44   :  { %1487 = vst [vmem:[%s3413_s2 + $0x420] sm:$0xff] %v1486_v4  ;;  %1489 = vst [vmem:[%s3413_s2 + $0x428] sm:$0xff] %v1488_v5  ;;  %v1492_v7 = vld [vmem:[%s3412_s0 + $0x438] sm:$0xff]  ;;  %v547_v8 = vld [vmem:[%s3414_s1] sm:$0xff] }
  0x45   :  { %1491 = vst [vmem:[%s3413_s2 + $0x430] sm:$0xff] %v1490_v6  ;;  %v1495_v9 = vld [vmem:[%s3414_s1 + $0x8] sm:$0xff]  ;;  %1493 = vst [vmem:[%s3413_s2 + $0x438] sm:$0xff] %v1492_v7  ;;  %v1497_v10 = vld [vmem:[%s3414_s1 + $0x10] sm:$0xff] }
  0x46   :  { %1494 = vst [vmem:[%s3413_s2 + $0x440] sm:$0xff] %v547_v8  ;;  %1496 = vst [vmem:[%s3413_s2 + $0x448] sm:$0xff] %v1495_v9  ;;  %v1499_v11 = vld [vmem:[%s3414_s1 + $0x18] sm:$0xff]  ;;  %v1501_v12 = vld [vmem:[%s3414_s1 + $0x20] sm:$0xff] }
  0x47   :  { %1498 = vst [vmem:[%s3413_s2 + $0x450] sm:$0xff] %v1497_v10  ;;  %1500 = vst [vmem:[%s3413_s2 + $0x458] sm:$0xff] %v1499_v11  ;;  %v1503_v13 = vld [vmem:[%s3414_s1 + $0x28] sm:$0xff]  ;;  %v1505_v14 = vld [vmem:[%s3414_s1 + $0x30] sm:$0xff] }
  0x48   :  { %1502 = vst [vmem:[%s3413_s2 + $0x460] sm:$0xff] %v1501_v12  ;;  %v1507_v15 = vld [vmem:[%s3414_s1 + $0x38] sm:$0xff]  ;;  %1504 = vst [vmem:[%s3413_s2 + $0x468] sm:$0xff] %v1503_v13  ;;  %v1509_v16 = vld [vmem:[%s3414_s1 + $0x40] sm:$0xff] }
  0x49   :  { %1506 = vst [vmem:[%s3413_s2 + $0x470] sm:$0xff] %v1505_v14  ;;  %1508 = vst [vmem:[%s3413_s2 + $0x478] sm:$0xff] %v1507_v15  ;;  %v1511_v17 = vld [vmem:[%s3414_s1 + $0x48] sm:$0xff]  ;;  %v1513_v18 = vld [vmem:[%s3414_s1 + $0x50] sm:$0xff] }
  0x4a   :  { %1510 = vst [vmem:[%s3413_s2 + $0x480] sm:$0xff] %v1509_v16  ;;  %1512 = vst [vmem:[%s3413_s2 + $0x488] sm:$0xff] %v1511_v17  ;;  %v1515_v19 = vld [vmem:[%s3414_s1 + $0x58] sm:$0xff]  ;;  %v1517_v20 = vld [vmem:[%s3414_s1 + $0x60] sm:$0xff] }
  0x4b   :  { %1514 = vst [vmem:[%s3413_s2 + $0x490] sm:$0xff] %v1513_v18  ;;  %v1519_v21 = vld [vmem:[%s3414_s1 + $0x68] sm:$0xff]  ;;  %1516 = vst [vmem:[%s3413_s2 + $0x498] sm:$0xff] %v1515_v19  ;;  %v1521_v22 = vld [vmem:[%s3414_s1 + $0x70] sm:$0xff] }
  0x4c   :  { %1518 = vst [vmem:[%s3413_s2 + $0x4a0] sm:$0xff] %v1517_v20  ;;  %1520 = vst [vmem:[%s3413_s2 + $0x4a8] sm:$0xff] %v1519_v21  ;;  %v1523_v23 = vld [vmem:[%s3414_s1 + $0x78] sm:$0xff]  ;;  %v1525_v24 = vld [vmem:[%s3414_s1 + $0x80] sm:$0xff] }
  0x4d   :  { %1522 = vst [vmem:[%s3413_s2 + $0x4b0] sm:$0xff] %v1521_v22  ;;  %1524 = vst [vmem:[%s3413_s2 + $0x4b8] sm:$0xff] %v1523_v23  ;;  %v1527_v25 = vld [vmem:[%s3414_s1 + $0x88] sm:$0xff]  ;;  %v1529_v26 = vld [vmem:[%s3414_s1 + $0x90] sm:$0xff] }
  0x4e   :  { %1526 = vst [vmem:[%s3413_s2 + $0x4c0] sm:$0xff] %v1525_v24  ;;  %v1531_v27 = vld [vmem:[%s3414_s1 + $0x98] sm:$0xff]  ;;  %1528 = vst [vmem:[%s3413_s2 + $0x4c8] sm:$0xff] %v1527_v25  ;;  %v1533_v28 = vld [vmem:[%s3414_s1 + $0xa0] sm:$0xff] }
  0x4f   :  { %1530 = vst [vmem:[%s3413_s2 + $0x4d0] sm:$0xff] %v1529_v26  ;;  %1532 = vst [vmem:[%s3413_s2 + $0x4d8] sm:$0xff] %v1531_v27  ;;  %v1535_v29 = vld [vmem:[%s3414_s1 + $0xa8] sm:$0xff]  ;;  %v1537_v30 = vld [vmem:[%s3414_s1 + $0xb0] sm:$0xff] }
  0x50   :  { %1534 = vst [vmem:[%s3413_s2 + $0x4e0] sm:$0xff] %v1533_v28  ;;  %1536 = vst [vmem:[%s3413_s2 + $0x4e8] sm:$0xff] %v1535_v29  ;;  %v1539_v31 = vld [vmem:[%s3414_s1 + $0xb8] sm:$0xff]  ;;  %v1541_v32 = vld [vmem:[%s3414_s1 + $0xc0] sm:$0xff] }
  0x51   :  { %1538 = vst [vmem:[%s3413_s2 + $0x4f0] sm:$0xff] %v1537_v30  ;;  %v1543_v33 = vld [vmem:[%s3414_s1 + $0xc8] sm:$0xff]  ;;  %1540 = vst [vmem:[%s3413_s2 + $0x4f8] sm:$0xff] %v1539_v31  ;;  %v1545_v34 = vld [vmem:[%s3414_s1 + $0xd0] sm:$0xff] }
  0x52   :  { %1542 = vst [vmem:[%s3413_s2 + $0x500] sm:$0xff] %v1541_v32  ;;  %1544 = vst [vmem:[%s3413_s2 + $0x508] sm:$0xff] %v1543_v33  ;;  %v1547_v35 = vld [vmem:[%s3414_s1 + $0xd8] sm:$0xff]  ;;  %v1549_v36 = vld [vmem:[%s3414_s1 + $0xe0] sm:$0xff] }
  0x53   :  { %1546 = vst [vmem:[%s3413_s2 + $0x510] sm:$0xff] %v1545_v34  ;;  %1548 = vst [vmem:[%s3413_s2 + $0x518] sm:$0xff] %v1547_v35  ;;  %v1551_v37 = vld [vmem:[%s3414_s1 + $0xe8] sm:$0xff]  ;;  %v1553_v38 = vld [vmem:[%s3414_s1 + $0xf0] sm:$0xff] }
  0x54   :  { %1550 = vst [vmem:[%s3413_s2 + $0x520] sm:$0xff] %v1549_v36  ;;  %v1555_v39 = vld [vmem:[%s3414_s1 + $0xf8] sm:$0xff]  ;;  %1552 = vst [vmem:[%s3413_s2 + $0x528] sm:$0xff] %v1551_v37  ;;  %v1557_v40 = vld [vmem:[%s3414_s1 + $0x100] sm:$0xff] }
  0x55   :  { %1554 = vst [vmem:[%s3413_s2 + $0x530] sm:$0xff] %v1553_v38  ;;  %1556 = vst [vmem:[%s3413_s2 + $0x538] sm:$0xff] %v1555_v39  ;;  %v1559_v41 = vld [vmem:[%s3414_s1 + $0x108] sm:$0xff]  ;;  %v1561_v42 = vld [vmem:[%s3414_s1 + $0x110] sm:$0xff] }
  0x56   :  { %1558 = vst [vmem:[%s3413_s2 + $0x540] sm:$0xff] %v1557_v40  ;;  %1560 = vst [vmem:[%s3413_s2 + $0x548] sm:$0xff] %v1559_v41  ;;  %v1563_v43 = vld [vmem:[%s3414_s1 + $0x118] sm:$0xff]  ;;  %v1565_v44 = vld [vmem:[%s3414_s1 + $0x120] sm:$0xff] }
  0x57   :  { %1562 = vst [vmem:[%s3413_s2 + $0x550] sm:$0xff] %v1561_v42  ;;  %v1567_v45 = vld [vmem:[%s3414_s1 + $0x128] sm:$0xff]  ;;  %1564 = vst [vmem:[%s3413_s2 + $0x558] sm:$0xff] %v1563_v43  ;;  %v1569_v46 = vld [vmem:[%s3414_s1 + $0x130] sm:$0xff] }
  0x58   :  { %1566 = vst [vmem:[%s3413_s2 + $0x560] sm:$0xff] %v1565_v44  ;;  %1568 = vst [vmem:[%s3413_s2 + $0x568] sm:$0xff] %v1567_v45  ;;  %v1571_v47 = vld [vmem:[%s3414_s1 + $0x138] sm:$0xff]  ;;  %v1573_v48 = vld [vmem:[%s3414_s1 + $0x140] sm:$0xff] }
  0x59   :  { %1570 = vst [vmem:[%s3413_s2 + $0x570] sm:$0xff] %v1569_v46  ;;  %1572 = vst [vmem:[%s3413_s2 + $0x578] sm:$0xff] %v1571_v47  ;;  %v1575_v49 = vld [vmem:[%s3414_s1 + $0x148] sm:$0xff]  ;;  %v1577_v50 = vld [vmem:[%s3414_s1 + $0x150] sm:$0xff] }
  0x5a   :  { %1574 = vst [vmem:[%s3413_s2 + $0x580] sm:$0xff] %v1573_v48  ;;  %v1579_v51 = vld [vmem:[%s3414_s1 + $0x158] sm:$0xff]  ;;  %1576 = vst [vmem:[%s3413_s2 + $0x588] sm:$0xff] %v1575_v49  ;;  %v1581_v52 = vld [vmem:[%s3414_s1 + $0x160] sm:$0xff] }
  0x5b   :  { %1578 = vst [vmem:[%s3413_s2 + $0x590] sm:$0xff] %v1577_v50  ;;  %1580 = vst [vmem:[%s3413_s2 + $0x598] sm:$0xff] %v1579_v51  ;;  %v1583_v53 = vld [vmem:[%s3414_s1 + $0x168] sm:$0xff]  ;;  %v1585_v54 = vld [vmem:[%s3414_s1 + $0x170] sm:$0xff] }
  0x5c   :  { %1582 = vst [vmem:[%s3413_s2 + $0x5a0] sm:$0xff] %v1581_v52  ;;  %1584 = vst [vmem:[%s3413_s2 + $0x5a8] sm:$0xff] %v1583_v53  ;;  %v1587_v55 = vld [vmem:[%s3414_s1 + $0x178] sm:$0xff]  ;;  %v1589_v56 = vld [vmem:[%s3414_s1 + $0x180] sm:$0xff] }
  0x5d   :  { %1586 = vst [vmem:[%s3413_s2 + $0x5b0] sm:$0xff] %v1585_v54  ;;  %v1591_v57 = vld [vmem:[%s3414_s1 + $0x188] sm:$0xff]  ;;  %1588 = vst [vmem:[%s3413_s2 + $0x5b8] sm:$0xff] %v1587_v55  ;;  %v1593_v58 = vld [vmem:[%s3414_s1 + $0x190] sm:$0xff] }
  0x5e   :  { %1590 = vst [vmem:[%s3413_s2 + $0x5c0] sm:$0xff] %v1589_v56  ;;  %1592 = vst [vmem:[%s3413_s2 + $0x5c8] sm:$0xff] %v1591_v57  ;;  %v1595_v59 = vld [vmem:[%s3414_s1 + $0x198] sm:$0xff]  ;;  %v1597_v60 = vld [vmem:[%s3414_s1 + $0x1a0] sm:$0xff] }
  0x5f   :  { %1594 = vst [vmem:[%s3413_s2 + $0x5d0] sm:$0xff] %v1593_v58  ;;  %1596 = vst [vmem:[%s3413_s2 + $0x5d8] sm:$0xff] %v1595_v59  ;;  %v1599_v61 = vld [vmem:[%s3414_s1 + $0x1a8] sm:$0xff]  ;;  %v1601_v62 = vld [vmem:[%s3414_s1 + $0x1b0] sm:$0xff] }
  0x60   :  { %1598 = vst [vmem:[%s3413_s2 + $0x5e0] sm:$0xff] %v1597_v60  ;;  %v1603_v63 = vld [vmem:[%s3414_s1 + $0x1b8] sm:$0xff]  ;;  %1600 = vst [vmem:[%s3413_s2 + $0x5e8] sm:$0xff] %v1599_v61  ;;  %v1605_v0 = vld [vmem:[%s3414_s1 + $0x1c0] sm:$0xff] }
  0x61   :  { %1602 = vst [vmem:[%s3413_s2 + $0x5f0] sm:$0xff] %v1601_v62  ;;  %1604 = vst [vmem:[%s3413_s2 + $0x5f8] sm:$0xff] %v1603_v63  ;;  %v1607_v1 = vld [vmem:[%s3414_s1 + $0x1c8] sm:$0xff]  ;;  %v1609_v2 = vld [vmem:[%s3414_s1 + $0x1d0] sm:$0xff] }
  0x62   :  { %1606 = vst [vmem:[%s3413_s2 + $0x600] sm:$0xff] %v1605_v0  ;;  %1608 = vst [vmem:[%s3413_s2 + $0x608] sm:$0xff] %v1607_v1  ;;  %v1611_v3 = vld [vmem:[%s3414_s1 + $0x1d8] sm:$0xff]  ;;  %v1613_v4 = vld [vmem:[%s3414_s1 + $0x1e0] sm:$0xff] }
  0x63   :  { %1610 = vst [vmem:[%s3413_s2 + $0x610] sm:$0xff] %v1609_v2  ;;  %v1615_v5 = vld [vmem:[%s3414_s1 + $0x1e8] sm:$0xff]  ;;  %1612 = vst [vmem:[%s3413_s2 + $0x618] sm:$0xff] %v1611_v3  ;;  %v1617_v6 = vld [vmem:[%s3414_s1 + $0x1f0] sm:$0xff] }
  0x64   :  { %1614 = vst [vmem:[%s3413_s2 + $0x620] sm:$0xff] %v1613_v4  ;;  %1616 = vst [vmem:[%s3413_s2 + $0x628] sm:$0xff] %v1615_v5  ;;  %v1619_v7 = vld [vmem:[%s3414_s1 + $0x1f8] sm:$0xff]  ;;  %v1621_v8 = vld [vmem:[%s3414_s1 + $0x200] sm:$0xff] }
  0x65   :  { %1618 = vst [vmem:[%s3413_s2 + $0x630] sm:$0xff] %v1617_v6  ;;  %1620 = vst [vmem:[%s3413_s2 + $0x638] sm:$0xff] %v1619_v7  ;;  %v1623_v9 = vld [vmem:[%s3414_s1 + $0x208] sm:$0xff]  ;;  %v1625_v10 = vld [vmem:[%s3414_s1 + $0x210] sm:$0xff] }
  0x66   :  { %1622 = vst [vmem:[%s3413_s2 + $0x640] sm:$0xff] %v1621_v8  ;;  %v1627_v11 = vld [vmem:[%s3414_s1 + $0x218] sm:$0xff]  ;;  %1624 = vst [vmem:[%s3413_s2 + $0x648] sm:$0xff] %v1623_v9  ;;  %v1629_v12 = vld [vmem:[%s3414_s1 + $0x220] sm:$0xff] }
  0x67   :  { %1626 = vst [vmem:[%s3413_s2 + $0x650] sm:$0xff] %v1625_v10  ;;  %1628 = vst [vmem:[%s3413_s2 + $0x658] sm:$0xff] %v1627_v11  ;;  %v1631_v13 = vld [vmem:[%s3414_s1 + $0x228] sm:$0xff]  ;;  %v1633_v14 = vld [vmem:[%s3414_s1 + $0x230] sm:$0xff] }
  0x68   :  { %1630 = vst [vmem:[%s3413_s2 + $0x660] sm:$0xff] %v1629_v12  ;;  %1632 = vst [vmem:[%s3413_s2 + $0x668] sm:$0xff] %v1631_v13  ;;  %v1635_v15 = vld [vmem:[%s3414_s1 + $0x238] sm:$0xff]  ;;  %v1637_v16 = vld [vmem:[%s3414_s1 + $0x240] sm:$0xff] }
  0x69   :  { %1634 = vst [vmem:[%s3413_s2 + $0x670] sm:$0xff] %v1633_v14  ;;  %v1639_v17 = vld [vmem:[%s3414_s1 + $0x248] sm:$0xff]  ;;  %1636 = vst [vmem:[%s3413_s2 + $0x678] sm:$0xff] %v1635_v15  ;;  %v1641_v18 = vld [vmem:[%s3414_s1 + $0x250] sm:$0xff] }
  0x6a   :  { %1638 = vst [vmem:[%s3413_s2 + $0x680] sm:$0xff] %v1637_v16  ;;  %1640 = vst [vmem:[%s3413_s2 + $0x688] sm:$0xff] %v1639_v17  ;;  %v1643_v19 = vld [vmem:[%s3414_s1 + $0x258] sm:$0xff]  ;;  %v1645_v20 = vld [vmem:[%s3414_s1 + $0x260] sm:$0xff] }
  0x6b   :  { %1642 = vst [vmem:[%s3413_s2 + $0x690] sm:$0xff] %v1641_v18  ;;  %1644 = vst [vmem:[%s3413_s2 + $0x698] sm:$0xff] %v1643_v19  ;;  %v1647_v21 = vld [vmem:[%s3414_s1 + $0x268] sm:$0xff]  ;;  %v1649_v22 = vld [vmem:[%s3414_s1 + $0x270] sm:$0xff] }
  0x6c   :  { %1646 = vst [vmem:[%s3413_s2 + $0x6a0] sm:$0xff] %v1645_v20  ;;  %v1651_v23 = vld [vmem:[%s3414_s1 + $0x278] sm:$0xff]  ;;  %1648 = vst [vmem:[%s3413_s2 + $0x6a8] sm:$0xff] %v1647_v21  ;;  %v1653_v24 = vld [vmem:[%s3414_s1 + $0x280] sm:$0xff] }
  0x6d   :  { %1650 = vst [vmem:[%s3413_s2 + $0x6b0] sm:$0xff] %v1649_v22  ;;  %1652 = vst [vmem:[%s3413_s2 + $0x6b8] sm:$0xff] %v1651_v23  ;;  %v1655_v25 = vld [vmem:[%s3414_s1 + $0x288] sm:$0xff]  ;;  %v1657_v26 = vld [vmem:[%s3414_s1 + $0x290] sm:$0xff] }
  0x6e   :  { %1654 = vst [vmem:[%s3413_s2 + $0x6c0] sm:$0xff] %v1653_v24  ;;  %1656 = vst [vmem:[%s3413_s2 + $0x6c8] sm:$0xff] %v1655_v25  ;;  %v1659_v27 = vld [vmem:[%s3414_s1 + $0x298] sm:$0xff]  ;;  %v1661_v28 = vld [vmem:[%s3414_s1 + $0x2a0] sm:$0xff] }
  0x6f   :  { %1658 = vst [vmem:[%s3413_s2 + $0x6d0] sm:$0xff] %v1657_v26  ;;  %v1663_v29 = vld [vmem:[%s3414_s1 + $0x2a8] sm:$0xff]  ;;  %1660 = vst [vmem:[%s3413_s2 + $0x6d8] sm:$0xff] %v1659_v27  ;;  %v1665_v30 = vld [vmem:[%s3414_s1 + $0x2b0] sm:$0xff] }
  0x70   :  { %1662 = vst [vmem:[%s3413_s2 + $0x6e0] sm:$0xff] %v1661_v28  ;;  %1664 = vst [vmem:[%s3413_s2 + $0x6e8] sm:$0xff] %v1663_v29  ;;  %v1667_v31 = vld [vmem:[%s3414_s1 + $0x2b8] sm:$0xff]  ;;  %v1669_v32 = vld [vmem:[%s3414_s1 + $0x2c0] sm:$0xff] }
  0x71   :  { %1666 = vst [vmem:[%s3413_s2 + $0x6f0] sm:$0xff] %v1665_v30  ;;  %1668 = vst [vmem:[%s3413_s2 + $0x6f8] sm:$0xff] %v1667_v31  ;;  %v1671_v33 = vld [vmem:[%s3414_s1 + $0x2c8] sm:$0xff]  ;;  %v1673_v34 = vld [vmem:[%s3414_s1 + $0x2d0] sm:$0xff] }
  0x72   :  { %1670 = vst [vmem:[%s3413_s2 + $0x700] sm:$0xff] %v1669_v32  ;;  %v1675_v35 = vld [vmem:[%s3414_s1 + $0x2d8] sm:$0xff]  ;;  %1672 = vst [vmem:[%s3413_s2 + $0x708] sm:$0xff] %v1671_v33  ;;  %v1677_v36 = vld [vmem:[%s3414_s1 + $0x2e0] sm:$0xff] }
  0x73   :  { %1674 = vst [vmem:[%s3413_s2 + $0x710] sm:$0xff] %v1673_v34  ;;  %1676 = vst [vmem:[%s3413_s2 + $0x718] sm:$0xff] %v1675_v35  ;;  %v1679_v37 = vld [vmem:[%s3414_s1 + $0x2e8] sm:$0xff]  ;;  %v1681_v38 = vld [vmem:[%s3414_s1 + $0x2f0] sm:$0xff] }
  0x74   :  { %1678 = vst [vmem:[%s3413_s2 + $0x720] sm:$0xff] %v1677_v36  ;;  %1680 = vst [vmem:[%s3413_s2 + $0x728] sm:$0xff] %v1679_v37  ;;  %v1683_v39 = vld [vmem:[%s3414_s1 + $0x2f8] sm:$0xff]  ;;  %v1685_v40 = vld [vmem:[%s3414_s1 + $0x300] sm:$0xff] }
  0x75   :  { %1682 = vst [vmem:[%s3413_s2 + $0x730] sm:$0xff] %v1681_v38  ;;  %v1687_v41 = vld [vmem:[%s3414_s1 + $0x308] sm:$0xff]  ;;  %1684 = vst [vmem:[%s3413_s2 + $0x738] sm:$0xff] %v1683_v39  ;;  %v1689_v42 = vld [vmem:[%s3414_s1 + $0x310] sm:$0xff] }
  0x76   :  { %1686 = vst [vmem:[%s3413_s2 + $0x740] sm:$0xff] %v1685_v40  ;;  %1688 = vst [vmem:[%s3413_s2 + $0x748] sm:$0xff] %v1687_v41  ;;  %v1691_v43 = vld [vmem:[%s3414_s1 + $0x318] sm:$0xff]  ;;  %v1693_v44 = vld [vmem:[%s3414_s1 + $0x320] sm:$0xff] }
  0x77   :  { %1690 = vst [vmem:[%s3413_s2 + $0x750] sm:$0xff] %v1689_v42  ;;  %1692 = vst [vmem:[%s3413_s2 + $0x758] sm:$0xff] %v1691_v43  ;;  %v1695_v45 = vld [vmem:[%s3414_s1 + $0x328] sm:$0xff]  ;;  %v1697_v46 = vld [vmem:[%s3414_s1 + $0x330] sm:$0xff] }
  0x78   :  { %1694 = vst [vmem:[%s3413_s2 + $0x760] sm:$0xff] %v1693_v44  ;;  %v1699_v47 = vld [vmem:[%s3414_s1 + $0x338] sm:$0xff]  ;;  %1696 = vst [vmem:[%s3413_s2 + $0x768] sm:$0xff] %v1695_v45  ;;  %v1701_v48 = vld [vmem:[%s3414_s1 + $0x340] sm:$0xff] }
  0x79   :  { %1698 = vst [vmem:[%s3413_s2 + $0x770] sm:$0xff] %v1697_v46  ;;  %1700 = vst [vmem:[%s3413_s2 + $0x778] sm:$0xff] %v1699_v47  ;;  %v1703_v49 = vld [vmem:[%s3414_s1 + $0x348] sm:$0xff]  ;;  %v1705_v50 = vld [vmem:[%s3414_s1 + $0x350] sm:$0xff] }
  0x7a   :  { %1702 = vst [vmem:[%s3413_s2 + $0x780] sm:$0xff] %v1701_v48  ;;  %1704 = vst [vmem:[%s3413_s2 + $0x788] sm:$0xff] %v1703_v49  ;;  %v1707_v51 = vld [vmem:[%s3414_s1 + $0x358] sm:$0xff]  ;;  %v1709_v52 = vld [vmem:[%s3414_s1 + $0x360] sm:$0xff] }
  0x7b   :  { %1706 = vst [vmem:[%s3413_s2 + $0x790] sm:$0xff] %v1705_v50  ;;  %v1711_v53 = vld [vmem:[%s3414_s1 + $0x368] sm:$0xff]  ;;  %1708 = vst [vmem:[%s3413_s2 + $0x798] sm:$0xff] %v1707_v51  ;;  %v1713_v54 = vld [vmem:[%s3414_s1 + $0x370] sm:$0xff] }
  0x7c   :  { %1710 = vst [vmem:[%s3413_s2 + $0x7a0] sm:$0xff] %v1709_v52  ;;  %1712 = vst [vmem:[%s3413_s2 + $0x7a8] sm:$0xff] %v1711_v53  ;;  %v1715_v55 = vld [vmem:[%s3414_s1 + $0x378] sm:$0xff]  ;;  %v1717_v56 = vld [vmem:[%s3414_s1 + $0x380] sm:$0xff] }
  0x7d   :  { %1714 = vst [vmem:[%s3413_s2 + $0x7b0] sm:$0xff] %v1713_v54  ;;  %1716 = vst [vmem:[%s3413_s2 + $0x7b8] sm:$0xff] %v1715_v55  ;;  %v1719_v57 = vld [vmem:[%s3414_s1 + $0x388] sm:$0xff]  ;;  %v1721_v58 = vld [vmem:[%s3414_s1 + $0x390] sm:$0xff] }
  0x7e   :  { %1718 = vst [vmem:[%s3413_s2 + $0x7c0] sm:$0xff] %v1717_v56  ;;  %v1723_v59 = vld [vmem:[%s3414_s1 + $0x398] sm:$0xff]  ;;  %1720 = vst [vmem:[%s3413_s2 + $0x7c8] sm:$0xff] %v1719_v57  ;;  %v1725_v60 = vld [vmem:[%s3414_s1 + $0x3a0] sm:$0xff] }
  0x7f   :  { %1722 = vst [vmem:[%s3413_s2 + $0x7d0] sm:$0xff] %v1721_v58  ;;  %1724 = vst [vmem:[%s3413_s2 + $0x7d8] sm:$0xff] %v1723_v59  ;;  %v1727_v61 = vld [vmem:[%s3414_s1 + $0x3a8] sm:$0xff]  ;;  %v1729_v62 = vld [vmem:[%s3414_s1 + $0x3b0] sm:$0xff] }
  0x80   :  { %1726 = vst [vmem:[%s3413_s2 + $0x7e0] sm:$0xff] %v1725_v60  ;;  %1728 = vst [vmem:[%s3413_s2 + $0x7e8] sm:$0xff] %v1727_v61  ;;  %v1731_v63 = vld [vmem:[%s3414_s1 + $0x3b8] sm:$0xff]  ;;  %v1733_v0 = vld [vmem:[%s3414_s1 + $0x3c0] sm:$0xff] }
  0x81   :  { %1730 = vst [vmem:[%s3413_s2 + $0x7f0] sm:$0xff] %v1729_v62  ;;  %v1735_v1 = vld [vmem:[%s3414_s1 + $0x3c8] sm:$0xff]  ;;  %1732 = vst [vmem:[%s3413_s2 + $0x7f8] sm:$0xff] %v1731_v63  ;;  %v1737_v2 = vld [vmem:[%s3414_s1 + $0x3d0] sm:$0xff] }
  0x82   :  { %1734 = vst [vmem:[%s3413_s2 + $0x800] sm:$0xff] %v1733_v0  ;;  %1736 = vst [vmem:[%s3413_s2 + $0x808] sm:$0xff] %v1735_v1  ;;  %v1739_v3 = vld [vmem:[%s3414_s1 + $0x3d8] sm:$0xff]  ;;  %v1741_v4 = vld [vmem:[%s3414_s1 + $0x3e0] sm:$0xff] }
  0x83   :  { %1738 = vst [vmem:[%s3413_s2 + $0x810] sm:$0xff] %v1737_v2  ;;  %1740 = vst [vmem:[%s3413_s2 + $0x818] sm:$0xff] %v1739_v3  ;;  %v1743_v5 = vld [vmem:[%s3414_s1 + $0x3e8] sm:$0xff]  ;;  %v1745_v6 = vld [vmem:[%s3414_s1 + $0x3f0] sm:$0xff] }
  0x84   :  { %1742 = vst [vmem:[%s3413_s2 + $0x820] sm:$0xff] %v1741_v4  ;;  %v1747_v7 = vld [vmem:[%s3414_s1 + $0x3f8] sm:$0xff]  ;;  %1744 = vst [vmem:[%s3413_s2 + $0x828] sm:$0xff] %v1743_v5  ;;  %v1749_v8 = vld [vmem:[%s3414_s1 + $0x400] sm:$0xff] }
  0x85   :  { %1746 = vst [vmem:[%s3413_s2 + $0x830] sm:$0xff] %v1745_v6  ;;  %1748 = vst [vmem:[%s3413_s2 + $0x838] sm:$0xff] %v1747_v7  ;;  %v1751_v9 = vld [vmem:[%s3414_s1 + $0x408] sm:$0xff]  ;;  %v1753_v10 = vld [vmem:[%s3414_s1 + $0x410] sm:$0xff] }
  0x86   :  { %1750 = vst [vmem:[%s3413_s2 + $0x840] sm:$0xff] %v1749_v8  ;;  %1752 = vst [vmem:[%s3413_s2 + $0x848] sm:$0xff] %v1751_v9  ;;  %v1755_v11 = vld [vmem:[%s3414_s1 + $0x418] sm:$0xff]  ;;  %v1757_v12 = vld [vmem:[%s3414_s1 + $0x420] sm:$0xff] }
  0x87   :  { %1754 = vst [vmem:[%s3413_s2 + $0x850] sm:$0xff] %v1753_v10  ;;  %v1759_v13 = vld [vmem:[%s3414_s1 + $0x428] sm:$0xff]  ;;  %1756 = vst [vmem:[%s3413_s2 + $0x858] sm:$0xff] %v1755_v11  ;;  %v1761_v14 = vld [vmem:[%s3414_s1 + $0x430] sm:$0xff] }
  0x88   :  { %1758 = vst [vmem:[%s3413_s2 + $0x860] sm:$0xff] %v1757_v12  ;;  %1760 = vst [vmem:[%s3413_s2 + $0x868] sm:$0xff] %v1759_v13  ;;  %v1763_v15 = vld [vmem:[%s3414_s1 + $0x438] sm:$0xff] }
  0x89   :  { %1762 = vst [vmem:[%s3413_s2 + $0x870] sm:$0xff] %v1761_v14  ;;  %1764 = vst [vmem:[%s3413_s2 + $0x878] sm:$0xff] %v1763_v15 }

// kernel: _forward_impl.1
= control target key start
LH: loop header
LB: loop body
LE: loop exit
PB: predicated region body
PF: predicated region fallthrough
CT: control target
= control target key end

     0   :  { %s1972_s0 = inlined_call_operand.vmem [shape: f32[40,512], index: 0, kind: input, shape index: {}]   ;;  %s1973_s1 = inlined_call_operand.vmem [shape: f32[40,512], index: 1, kind: input, shape index: {}]   ;;  %s1974_s2 = inlined_call_operand.vmem [shape: f32[40,512], index: 2, kind: output, shape index: {0}]   ;;  %s1975_s3 = inlined_call_operand.vmem [shape: f32[40,512], index: 3, kind: output, shape index: {1}]  }
   0x1   :  { %v13_v0 = vld [vmem:[%s1972_s0] sm:$0xff]  ;;  %v14_v2 = vld [vmem:[%s1972_s0 + $0x8] sm:$0xff]  ;;  %v15_v7 = vld [vmem:[%s1972_s0 + $0x10] sm:$0xff] }
   0x2   :  { %v53_v1 = vld [vmem:[%s1973_s1] sm:$0xff]  ;;  %v930_v3 = vmax.f32 %v13_v0, 1e-10  ;;  %v934_v5 = vmax.f32 %v14_v2, 1e-10  ;;  %v54_v6 = vld [vmem:[%s1973_s1 + $0x8] sm:$0xff] }
   0x3   :  { %v932_v4 = vmax.f32 %v53_v1, 1e-10  ;;  %v55_v8 = vld [vmem:[%s1973_s1 + $0x10] sm:$0xff]  ;;  %v949_v11 = vmax.f32 %v54_v6, 1e-10  ;;  %v16_v13 = vld [vmem:[%s1972_s0 + $0x18] sm:$0xff] }
   0x4   :  { %v93_v9 = vmul.f32 %v930_v3, %v930_v3  ;;  %v94_v12 = vmul.f32 %v934_v5, %v934_v5  ;;  %v56_v14 = vld [vmem:[%s1973_s1 + $0x18] sm:$0xff]  ;;  %v17_v15 = vld [vmem:[%s1972_s0 + $0x20] sm:$0xff]  ;;  %v962_v16 = vmax.f32 %v15_v7, 1e-10  ;;  %v964_v17 = vmax.f32 %v55_v8, 1e-10 }
   0x5   :  { %v113_v10 = vmul.f32 %v932_v4, %v932_v4  ;;  %v966_v18 = vmax.f32 %v16_v13, 1e-10  ;;  %v970_v19 = vmin.f32 %v932_v4, %v930_v3  ;;  %v114_v21 = vmul.f32 %v949_v11, %v949_v11  ;;  %v57_v24 = vld [vmem:[%s1973_s1 + $0x20] sm:$0xff]  ;;  %v18_v25 = vld [vmem:[%s1972_s0 + $0x28] sm:$0xff]  ;;  %v19_v31 = vld [vmem:[%s1972_s0 + $0x30] sm:$0xff] }
   0x6   :  { %v974_v22 = vmax.f32 %v56_v14, 1e-10  ;;  %v976_v23 = vmax.f32 %v17_v15, 1e-10  ;;  %v95_v26 = vmul.f32 %v962_v16, %v962_v16  ;;  %v115_v27 = vmul.f32 %v964_v17, %v964_v17  ;;  %v58_v30 = vld [vmem:[%s1973_s1 + $0x28] sm:$0xff]  ;;  %v59_v32 = vld [vmem:[%s1973_s1 + $0x30] sm:$0xff] }
   0x7   :  { %v133_v20 = vadd.f32 %v113_v10, %v93_v9  ;;  %v96_v28 = vmul.f32 %v966_v18, %v966_v18  ;;  %v990_v29 = vmax.f32 %v57_v24, 1e-10  ;;  %v134_v33 = vadd.f32 %v114_v21, %v94_v12  ;;  %v20_v40 = vld [vmem:[%s1972_s0 + $0x38] sm:$0xff]  ;;  %v21_v45 = vld [vmem:[%s1972_s0 + $0x40] sm:$0xff]  ;;  %v22_v50 = vld [vmem:[%s1972_s0 + $0x48] sm:$0xff] }
   0x8   :  { %v116_v34 = vmul.f32 %v974_v22, %v974_v22  ;;  %v97_v35 = vmul.f32 %v976_v23, %v976_v23  ;;  %v135_v36 = vadd.f32 %v115_v27, %v95_v26  ;;  %v1007_v38 = vmax.f32 %v18_v25, 1e-10  ;;  %v60_v44 = vld [vmem:[%s1973_s1 + $0x38] sm:$0xff]  ;;  %v61_v49 = vld [vmem:[%s1973_s1 + $0x40] sm:$0xff]  ;;  %v62_v54 = vld [vmem:[%s1973_s1 + $0x48] sm:$0xff] }
   0x9   :  { %821 = vlog2.f32 %v133_v20  ;;  %v117_v37 = vmul.f32 %v990_v29, %v990_v29  ;;  %v1009_v39 = vmax.f32 %v58_v30, 1e-10  ;;  %v1014_v42 = vmax.f32 %v19_v31, 1e-10  ;;  %v23_v58 = vld [vmem:[%s1972_s0 + $0x50] sm:$0xff]  ;;  %v24_v0 = vld [vmem:[%s1972_s0 + $0x58] sm:$0xff] }
   0xa   :  { %2024 = vst [vmem:[#allocation2_spill] sm:$0xff] %v1007_v38  ;;  %823 = vlog2.f32 %v134_v33  ;;  %v136_v41 = vadd.f32 %v116_v34, %v96_v28  ;;  %v1016_v43 = vmax.f32 %v59_v32, 1e-10  ;;  %v98_v47 = vmul.f32 %v1007_v38, %v1007_v38  ;;  %v63_v63 = vld [vmem:[%s1973_s1 + $0x50] sm:$0xff]  ;;  %v64_v7 = vld [vmem:[%s1973_s1 + $0x58] sm:$0xff]  ;;  %v25_v8 = vld [vmem:[%s1972_s0 + $0x60] sm:$0xff] }
   0xb   :  { %2025 = vst [vmem:[#allocation3_spill] sm:$0xff] %v1009_v39  ;;  %2026 = vst [vmem:[#allocation4_spill] sm:$0xff] %v1014_v42  ;;  %825 = vlog2.f32 %v135_v36  ;;  %v137_v46 = vadd.f32 %v117_v37, %v97_v35  ;;  %v118_v48 = vmul.f32 %v1009_v39, %v1009_v39  ;;  %v99_v51 = vmul.f32 %v1014_v42, %v1014_v42  ;;  %v65_v21 = vld [vmem:[%s1973_s1 + $0x60] sm:$0xff]  ;;  %v26_v37 = vld [vmem:[%s1972_s0 + $0x68] sm:$0xff] }
   0xc   :  { %2027 = vst [vmem:[#allocation5_spill] sm:$0xff] %v1016_v43  ;;  %827 = vlog2.f32 %v136_v41  ;;  %v119_v52 = vmul.f32 %v1016_v43, %v1016_v43  ;;  %v1038_v53 = vmax.f32 %v20_v40, 1e-10  ;;  %v1043_v56 = vmax.f32 %v60_v44, 1e-10 }
   0xd   :  { %829 = vlog2.f32 %v137_v46  ;;  %v138_v55 = vadd.f32 %v118_v48, %v98_v47  ;;  %v1045_v57 = vmax.f32 %v21_v45, 1e-10  ;;  %v1052_v61 = vmax.f32 %v61_v49, 1e-10  ;;  %v66_v46 = vld [vmem:[%s1973_s1 + $0x68] sm:$0xff] }
   0xe   :  { %2028 = vst [vmem:[#allocation6_spill] sm:$0xff] %v1038_v53  ;;  %2029 = vst [vmem:[#allocation7_spill] sm:$0xff] %v1043_v56  ;;  %v139_v59 = vadd.f32 %v119_v52, %v99_v51  ;;  %v100_v60 = vmul.f32 %v1038_v53, %v1038_v53  ;;  %v1054_v62 = vmax.f32 %v22_v50, 1e-10  ;;  %v120_v1 = vmul.f32 %v1043_v56, %v1043_v56  ;;  %v27_v52 = vld [vmem:[%s1972_s0 + $0x70] sm:$0xff] }
   0xf   :  { %2030 = vst [vmem:[#allocation8_spill] sm:$0xff] %v1045_v57  ;;  %2031 = vst [vmem:[#allocation9_spill] sm:$0xff] %v1052_v61  ;;  %831 = vlog2.f32 %v138_v55  ;;  %v101_v2 = vmul.f32 %v1045_v57, %v1045_v57  ;;  %v1066_v6 = vmax.f32 %v62_v54, 1e-10  ;;  %v121_v9 = vmul.f32 %v1052_v61, %v1052_v61  ;;  %v67_v54 = vld [vmem:[%s1973_s1 + $0x70] sm:$0xff]  ;;  %v28_v55 = vld [vmem:[%s1972_s0 + $0x78] sm:$0xff] }
  0x10   :  { %833 = vlog2.f32 %v139_v59  ;;  %v102_v10 = vmul.f32 %v1054_v62, %v1054_v62  ;;  %v1078_v12 = vmax.f32 %v23_v58, 1e-10  ;;  %v140_v13 = vadd.f32 %v120_v1, %v100_v60 }
  0x11   :  { %v122_v14 = vmul.f32 %v1066_v6, %v1066_v6  ;;  %v1082_v15 = vmax.f32 %v63_v63, 1e-10  ;;  %v1084_v20 = vmax.f32 %v24_v0, 1e-10  ;;  %v141_v25 = vadd.f32 %v121_v9, %v101_v2  ;;  %v68_v0 = vld [vmem:[%s1973_s1 + $0x78] sm:$0xff]  ;;  %v69_v9 = vld [vmem:[%s1973_s1 + $0x80] sm:$0xff] }
  0x12   :  { %v103_v26 = vmul.f32 %v1078_v12, %v1078_v12  ;;  %v1091_v27 = vmax.f32 %v64_v7, 1e-10  ;;  %v1093_v28 = vmax.f32 %v25_v8, 1e-10  ;;  %835 = vlog2.f32 %v140_v13  ;;  %v29_v8 = vld [vmem:[%s1972_s0 + $0x80] sm:$0xff] }
  0x13   :  { %v822_v24 = vpop.eup %821  ;;  %v142_v31 = vadd.f32 %v122_v14, %v102_v10  ;;  %v123_v32 = vmul.f32 %v1082_v15, %v1082_v15  ;;  %837 = vlog2.f32 %v141_v25  ;;  %v104_v34 = vmul.f32 %v1084_v20, %v1084_v20 }
  0x14   :  { %2032 = vst [vmem:[#allocation10_spill] sm:$0xff] %v1091_v27  ;;  %2033 = vst [vmem:[#allocation11_spill] sm:$0xff] %v1093_v28  ;;  %v154_v30 = vmul.f32 0.6931472, %v822_v24  ;;  %v824_v33 = vpop.eup %823  ;;  %v124_v35 = vmul.f32 %v1091_v27, %v1091_v27  ;;  %v1101_v36 = vmax.f32 %v65_v21, 1e-10  ;;  %v105_v50 = vmul.f32 %v1093_v28, %v1093_v28 }
  0x15   :  { %v826_v40 = vpop.eup %825  ;;  %v156_v44 = vmul.f32 0.6931472, %v824_v33  ;;  %839 = vlog2.f32 %v142_v31  ;;  %v143_v45 = vadd.f32 %v123_v32, %v103_v26  ;;  %v1125_v63 = vmax.f32 %v26_v37, 1e-10  ;;  %v30_v37 = vld [vmem:[%s1972_s0 + $0x88] sm:$0xff] }
  0x16   :  { %2034 = vst [vmem:[#allocation12_spill] sm:$0xff] %v1101_v36  ;;  %v193_v41 = vmul.f32 2.1714723, %v154_v30  ;;  %v828_v47 = vpop.eup %827  ;;  %v158_v48 = vmul.f32 0.6931472, %v826_v40  ;;  %v144_v49 = vadd.f32 %v124_v35, %v104_v34  ;;  %v125_v51 = vmul.f32 %v1101_v36, %v1101_v36 }
  0x17   :  { %v830_v58 = vpop.eup %829  ;;  %v194_v59 = vmul.f32 2.1714723, %v156_v44  ;;  %v160_v60 = vmul.f32 0.6931472, %v828_v47  ;;  %841 = vlog2.f32 %v143_v45  ;;  %2035 = vst [vmem:[#allocation13_spill] sm:$0xff] %v1125_v63  ;;  %v106_v21 = vmul.f32 %v1125_v63, %v1125_v63 }
  0x18   :  { %213 = vst [vmem:[%s1974_s2] sm:$0xff] %v193_v41  ;;  %v195_v1 = vmul.f32 2.1714723, %v158_v48  ;;  %v162_v2 = vmul.f32 0.6931472, %v830_v58  ;;  %843 = vlog2.f32 %v144_v49  ;;  %v145_v7 = vadd.f32 %v125_v51, %v105_v50 }
  0x19   :  { %v832_v10 = vpop.eup %831  ;;  %214 = vst [vmem:[%s1974_s2 + $0x8] sm:$0xff] %v194_v59  ;;  %v196_v13 = vmul.f32 2.1714723, %v160_v60  ;;  %v1139_v14 = vmax.f32 %v66_v46, 1e-10  ;;  %v70_v59 = vld [vmem:[%s1973_s1 + $0x88] sm:$0xff]  ;;  %vm673_vm0 = vcmp.gt.f32.partialorder %v932_v4, %v930_v3  ;;  %vm674_vm1 = vcmp.gt.f32.partialorder %v949_v11, %v934_v5 }
  0x1a   :  { %v1143_v24 = vmax.f32 %v27_v52, 1e-10  ;;  %v834_v25 = vpop.eup %833  ;;  %215 = vst [vmem:[%s1974_s2 + $0x10] sm:$0xff] %v195_v1  ;;  %v197_v26 = vmul.f32 2.1714723, %v162_v2  ;;  %845 = vlog2.f32 %v145_v7  ;;  %v31_v7 = vld [vmem:[%s1972_s0 + $0x90] sm:$0xff]  ;;  %vm675_vm5 = vcmp.gt.f32.partialorder %v964_v17, %v962_v16 }
  0x1b   :  { %2036 = vst [vmem:[#allocation14_spill] sm:$0xff] %v1139_v14  ;;  %v164_v30 = vmul.f32 0.6931472, %v832_v10  ;;  %v1148_v31 = vmax.f32 %v67_v54, 1e-10  ;;  %216 = vst [vmem:[%s1974_s2 + $0x18] sm:$0xff] %v196_v13  ;;  %v126_v33 = vmul.f32 %v1139_v14, %v1139_v14  ;;  %vm676_vm6 = vcmp.gt.f32.partialorder %v974_v22, %v966_v18 }
  0x1c   :  { %2037 = vst [vmem:[#allocation15_spill] sm:$0xff] %v1143_v24  ;;  %v166_v32 = vmul.f32 0.6931472, %v834_v25  ;;  %v107_v34 = vmul.f32 %v1143_v24, %v1143_v24  ;;  %v1157_v35 = vmax.f32 %v28_v55, 1e-10  ;;  %217 = vst [vmem:[%s1974_s2 + $0x20] sm:$0xff] %v197_v26  ;;  %v836_v46 = vpop.eup %835  ;;  %vm677_vm7 = vcmp.gt.f32.partialorder %v990_v29, %v976_v23 }
  0x1d   :  { %2038 = vst [vmem:[#allocation16_spill] sm:$0xff] %v1148_v31  ;;  %v198_v40 = vmul.f32 2.1714723, %v164_v30  ;;  %v127_v41 = vmul.f32 %v1148_v31, %v1148_v31  ;;  %v1167_v44 = vmax.f32 %v68_v0, 1e-10  ;;  %v146_v48 = vadd.f32 %v126_v33, %v106_v21  ;;  %v838_v51 = vpop.eup %837  ;;  %v71_v13 = vld [vmem:[%s1973_s1 + $0x90] sm:$0xff] }
  0x1e   :  { %2039 = vst [vmem:[#allocation17_spill] sm:$0xff] %v1157_v35  ;;  %v1169_v45 = vmax.f32 %v29_v8, 1e-10  ;;  %v199_v47 = vmul.f32 2.1714723, %v166_v32  ;;  %v108_v49 = vmul.f32 %v1157_v35, %v1157_v35  ;;  %v32_v33 = vld [vmem:[%s1972_s0 + $0x98] sm:$0xff]  ;;  %vm678_vm10 = vcmp.gt.f32.partialorder %v1009_v39, %v1007_v38 }
  0x1f   :  { %2040 = vst [vmem:[#allocation18_spill] sm:$0xff] %v1167_v44  ;;  %v1173_v50 = vmax.f32 %v69_v9, 1e-10  ;;  %218 = vst [vmem:[%s1974_s2 + $0x28] sm:$0xff] %v198_v40  ;;  %v168_v52 = vmul.f32 0.6931472, %v836_v46  ;;  %v147_v54 = vadd.f32 %v127_v41, %v107_v34  ;;  %v128_v55 = vmul.f32 %v1167_v44, %v1167_v44  ;;  %v840_v60 = vpop.eup %839 }
  0x20   :  { %2041 = vst [vmem:[#allocation19_spill] sm:$0xff] %v1169_v45  ;;  %v109_v58 = vmul.f32 %v1169_v45, %v1169_v45  ;;  %219 = vst [vmem:[%s1974_s2 + $0x30] sm:$0xff] %v199_v47  ;;  %v170_v0 = vmul.f32 0.6931472, %v838_v51  ;;  %847 = vlog2.f32 %v146_v48  ;;  %v1190_v2 = vmax.f32 %v30_v37, 1e-10 }
  0x21   :  { %2042 = vst [vmem:[#allocation20_spill] sm:$0xff] %v1173_v50  ;;  %v129_v1 = vmul.f32 %v1173_v50, %v1173_v50  ;;  %v200_v8 = vmul.f32 2.1714723, %v168_v52  ;;  %v172_v9 = vmul.f32 0.6931472, %v840_v60  ;;  %849 = vlog2.f32 %v147_v54  ;;  %v842_v21 = vpop.eup %841  ;;  %v72_v34 = vld [vmem:[%s1973_s1 + $0x98] sm:$0xff] }
  0x22   :  { %2043 = vst [vmem:[#allocation21_spill] sm:$0xff] %v1190_v2  ;;  %v148_v10 = vadd.f32 %v128_v55, %v108_v49  ;;  %v201_v25 = vmul.f32 2.1714723, %v170_v0  ;;  %v1198_v30 = vmax.f32 %v70_v59, 1e-10  ;;  %v110_v32 = vmul.f32 %v1190_v2, %v1190_v2  ;;  %v844_v37 = vpop.eup %843 }
  0x23   :  { %v149_v26 = vadd.f32 %v129_v1, %v109_v58  ;;  %220 = vst [vmem:[%s1974_s2 + $0x38] sm:$0xff] %v200_v8  ;;  %v202_v40 = vmul.f32 2.1714723, %v172_v9  ;;  %v174_v41 = vmul.f32 0.6931472, %v842_v21  ;;  %v253_v9 = vmax.f32 %v932_v4, %v930_v3 }
  0x24   :  { %2044 = vst [vmem:[#allocation22_spill] sm:$0xff] %v1198_v30  ;;  %851 = vlog2.f32 %v148_v10  ;;  %v1211_v46 = vmax.f32 %v31_v7, 1e-10  ;;  %221 = vst [vmem:[%s1974_s2 + $0x40] sm:$0xff] %v201_v25  ;;  %v176_v47 = vmul.f32 0.6931472, %v844_v37  ;;  %v130_v48 = vmul.f32 %v1198_v30, %v1198_v30  ;;  %v846_v51 = vpop.eup %845 }
  0x25   :  { %853 = vlog2.f32 %v149_v26  ;;  %v1218_v49 = vmax.f32 %v71_v13, 1e-10  ;;  %222 = vst [vmem:[%s1974_s2 + $0x48] sm:$0xff] %v202_v40  ;;  %v203_v52 = vmul.f32 2.1714723, %v174_v41  ;;  %v353_v26 = vadd.f32 %v253_v9, %v970_v19 }
  0x26   :  { %2045 = vst [vmem:[#allocation23_spill] sm:$0xff] %v1211_v46  ;;  %v111_v54 = vmul.f32 %v1211_v46, %v1211_v46  ;;  %v1225_v55 = vmax.f32 %v32_v33, 1e-10  ;;  %v1227_v58 = vmax.f32 %v72_v34, 1e-10  ;;  %v150_v0 = vadd.f32 %v130_v48, %v110_v32 }
  0x27   :  { %2046 = vst [vmem:[#allocation24_spill] sm:$0xff] %v1218_v49  ;;  %v204_v59 = vmul.f32 2.1714723, %v176_v47  ;;  %v178_v60 = vmul.f32 0.6931472, %v846_v51  ;;  %v131_v1 = vmul.f32 %v1218_v49, %v1218_v49  ;;  %223 = vst [vmem:[%s1974_s2 + $0x50] sm:$0xff] %v203_v52  ;;  %v1250_v32 = vmin.f32 %v949_v11, %v934_v5 }
  0x28   :  { %2047 = vst [vmem:[#allocation25_spill] sm:$0xff] %v1225_v55  ;;  %2048 = vst [vmem:[#allocation26_spill] sm:$0xff] %v1227_v58  ;;  %v112_v7 = vmul.f32 %v1225_v55, %v1225_v55  ;;  %v132_v8 = vmul.f32 %v1227_v58, %v1227_v58  ;;  %855 = vlog2.f32 %v150_v0  ;;  %v1245_v25 = vmul.f32 0.41421357, %v253_v9 }
  0x29   :  { %224 = vst [vmem:[%s1974_s2 + $0x58] sm:$0xff] %v204_v59  ;;  %v205_v10 = vmul.f32 2.1714723, %v178_v60  ;;  %v151_v13 = vadd.f32 %v131_v1, %v111_v54  ;;  %v254_v34 = vmax.f32 %v949_v11, %v934_v5  ;;  %v255_v41 = vmax.f32 %v964_v17, %v962_v16 }
  0x2a   :  { %v152_v21 = vadd.f32 %v132_v8, %v112_v7  ;;  %v848_v33 = vpop.eup %847  ;;  %vm293_vm2 = vcmp.gt.f32.partialorder %v970_v19, %v1245_v25  ;;  %v1270_v52 = vmin.f32 %v964_v17, %v962_v16  ;;  %vm679_vm12 = vcmp.gt.f32.partialorder %v1016_v43, %v1014_v42 }
  0x2b   :  { %225 = vst [vmem:[%s1974_s2 + $0x60] sm:$0xff] %v205_v10  ;;  %857 = vlog2.f32 %v151_v13  ;;  %v850_v37 = vpop.eup %849  ;;  %v180_v40 = vmul.f32 0.6931472, %v848_v33  ;;  %v373_v48 = vsel %vm293_vm2, %v353_v26, %v253_v9  ;;  %v1266_v51 = vmul.f32 0.41421357, %v254_v34 }
  0x2c   :  { %859 = vlog2.f32 %v152_v21  ;;  %v182_v47 = vmul.f32 0.6931472, %v850_v37  ;;  %v354_v60 = vadd.f32 %v254_v34, %v1250_v32  ;;  %v1275_v8 = vmul.f32 0.41421357, %v255_v41 }
  0x2d   :  { %v206_v59 = vmul.f32 2.1714723, %v180_v40  ;;  %861 = vrcp.f32 %v373_v48  ;;  %vm294_vm3 = vcmp.gt.f32.partialorder %v1250_v32, %v1266_v51  ;;  %v313_v13 = vsub.f32 %v970_v19, %v253_v9 }
  0x2e   :  { %v852_v54 = vpop.eup %851  ;;  %v207_v1 = vmul.f32 2.1714723, %v182_v47  ;;  %v314_v21 = vsub.f32 %v1250_v32, %v254_v34  ;;  %v374_v26 = vsel %vm294_vm3, %v354_v60, %v254_v34  ;;  %vm295_vm4 = vcmp.gt.f32.partialorder %v1270_v52, %v1275_v8 }
  0x2f   :  { %v854_v0 = vpop.eup %853  ;;  %v184_v7 = vmul.f32 0.6931472, %v852_v54  ;;  %226 = vst [vmem:[%s1974_s2 + $0x68] sm:$0xff] %v206_v59  ;;  %863 = vrcp.f32 %v374_v26  ;;  %v355_v37 = vadd.f32 %v255_v41, %v1270_v52  ;;  %v315_v9 = vsub.f32 %v1270_v52, %v255_v41 }
  0x30   :  { %v186_v10 = vmul.f32 0.6931472, %v854_v0  ;;  %227 = vst [vmem:[%s1974_s2 + $0x70] sm:$0xff] %v207_v1  ;;  %v1296_v34 = vmin.f32 %v974_v22, %v966_v18  ;;  %v256_v54 = vmax.f32 %v974_v22, %v966_v18  ;;  %v1310_v59 = vmin.f32 %v990_v29, %v976_v23 }
  0x31   :  { %v208_v33 = vmul.f32 2.1714723, %v184_v7  ;;  %v375_v48 = vsel %vm295_vm4, %v355_v37, %v255_v41  ;;  %v257_v0 = vmax.f32 %v990_v29, %v976_v23  ;;  %v333_v1 = vsel %vm293_vm2, %v313_v13, %v970_v19 }
  0x32   :  { %v209_v40 = vmul.f32 2.1714723, %v186_v10  ;;  %v856_v47 = vpop.eup %855  ;;  %865 = vrcp.f32 %v375_v48  ;;  %v334_v7 = vsel %vm294_vm3, %v314_v21, %v1250_v32  ;;  %v1327_v10 = vmul.f32 0.41421357, %v256_v54 }
  0x33   :  { %228 = vst [vmem:[%s1974_s2 + $0x78] sm:$0xff] %v208_v33  ;;  %v188_v60 = vmul.f32 0.6931472, %v856_v47  ;;  %v356_v26 = vadd.f32 %v256_v54, %v1296_v34  ;;  %v1330_v47 = vmul.f32 0.41421357, %v257_v0  ;;  %v1334_v48 = vmin.f32 %v1009_v39, %v1007_v38 }
  0x34   :  { %229 = vst [vmem:[%s1974_s2 + $0x80] sm:$0xff] %v209_v40  ;;  %vm296_vm8 = vcmp.gt.f32.partialorder %v1296_v34, %v1327_v10  ;;  %v357_v13 = vadd.f32 %v257_v0, %v1310_v59  ;;  %v258_v21 = vmax.f32 %v1009_v39, %v1007_v38  ;;  %v316_v30 = vsub.f32 %v1296_v34, %v256_v54 }
  0x35   :  { %v858_v41 = vpop.eup %857  ;;  %v210_v37 = vmul.f32 2.1714723, %v188_v60  ;;  %vm297_vm9 = vcmp.gt.f32.partialorder %v1310_v59, %v1330_v47  ;;  %vm680_vm15 = vcmp.gt.f32.partialorder %v1043_v56, %v1038_v53  ;;  %v1529_v10 = vmin.f32 %v1066_v6, %v1054_v62 }
  0x36   :  { %v860_v33 = vpop.eup %859  ;;  %v190_v40 = vmul.f32 0.6931472, %v858_v41  ;;  %v335_v41 = vsel %vm295_vm4, %v315_v9, %v1270_v52  ;;  %v377_v9 = vsel %vm297_vm9, %v357_v13, %v257_v0  ;;  %v336_v13 = vsel %vm296_vm8, %v316_v30, %v1296_v34 }
  0x37   :  { %v192_v58 = vmul.f32 0.6931472, %v860_v33  ;;  %v862_v55 = vpop.eup %861  ;;  %230 = vst [vmem:[%s1974_s2 + $0x88] sm:$0xff] %v210_v37  ;;  %v376_v33 = vsel %vm296_vm8, %v356_v26, %v256_v54  ;;  %v317_v37 = vsub.f32 %v1310_v59, %v257_v0  ;;  %v1363_v26 = vmul.f32 0.41421357, %v258_v21 }
  0x38   :  { %v211_v60 = vmul.f32 2.1714723, %v190_v40  ;;  %v1353_v46 = vmul.f32 %v862_v55, %v333_v1  ;;  %867 = vrcp.f32 %v376_v33  ;;  %v358_v40 = vadd.f32 %v258_v21, %v1334_v48 }
  0x39   :  { %v212_v49 = vmul.f32 2.1714723, %v192_v58  ;;  %v864_v58 = vpop.eup %863  ;;  %869 = vrcp.f32 %v377_v9  ;;  %v1375_v54 = vmin.f32 %v1016_v43, %v1014_v42  ;;  %vm298_vm11 = vcmp.gt.f32.partialorder %v1334_v48, %v1363_v26 }
  0x3a   :  { %231 = vst [vmem:[%s1974_s2 + $0x90] sm:$0xff] %v211_v60  ;;  %v433_v55 = vmul.f32 %v1353_v46, %v1353_v46  ;;  %v1377_v0 = vmul.f32 %v864_v58, %v334_v7  ;;  %v259_v1 = vmax.f32 %v1016_v43, %v1014_v42  ;;  %v378_v7 = vsel %vm298_vm11, %v358_v40, %v258_v21 }
  0x3b   :  { %232 = vst [vmem:[%s1974_s2 + $0x98] sm:$0xff] %v212_v49  ;;  %2049 = vst [vmem:[#allocation27_spill] sm:$0xff] %v1375_v54  ;;  %v318_v9 = vsub.f32 %v1334_v48, %v258_v21  ;;  %871 = vrcp.f32 %v378_v7  ;;  %v1402_v30 = vmin.f32 %v1043_v56, %v1038_v53  ;;  %v337_v40 = vsel %vm297_vm9, %v317_v37, %v1310_v59 }
  0x3c   :  { %v453_v49 = vmul.f32 0.080537446, %v433_v55  ;;  %v866_v60 = vpop.eup %865  ;;  %v434_v33 = vmul.f32 %v1377_v0, %v1377_v0  ;;  %v1395_v58 = vmul.f32 0.41421357, %v259_v1  ;;  %v359_v45 = vadd.f32 %v259_v1, %v1375_v54 }
  0x3d   :  { %v1397_v50 = vmul.f32 %v866_v60, %v335_v41  ;;  %2051 = vst [vmem:[#allocation29_spill] sm:$0xff] %v1402_v30  ;;  %v260_v21 = vmax.f32 %v1043_v56, %v1038_v53  ;;  %v338_v37 = vsel %vm298_vm11, %v318_v9, %v1334_v48  ;;  %v319_v63 = vsub.f32 %v1375_v54, %v259_v1 }
  0x3e   :  { %2050 = vst [vmem:[#allocation28_spill] sm:$0xff] %v1395_v58  ;;  %v781_v2 = vadd.f32 -0.13877685, %v453_v49  ;;  %v454_v44 = vmul.f32 0.080537446, %v434_v33  ;;  %vm299_vm13 = vcmp.gt.f32.partialorder %v1375_v54, %v1395_v58  ;;  %v573_v49 = vmul.f32 %v433_v55, %v1353_v46 }
  0x3f   :  { %v435_v7 = vmul.f32 %v1397_v50, %v1397_v50  ;;  %v379_v60 = vsel %vm299_vm13, %v359_v45, %v259_v1  ;;  %v1422_v31 = vmul.f32 0.41421357, %v260_v21  ;;  %v360_v36 = vadd.f32 %v260_v21, %v1402_v30 }
  0x40   :  { %v493_v41 = vmul.f32 %v781_v2, %v433_v55  ;;  %v782_v35 = vadd.f32 -0.13877685, %v454_v44  ;;  %873 = vrcp.f32 %v379_v60  ;;  %v320_v60 = vsub.f32 %v1402_v30, %v260_v21 }
  0x41   :  { %2052 = vst [vmem:[#allocation30_spill] sm:$0xff] %v1422_v31  ;;  %v455_v14 = vmul.f32 0.080537446, %v435_v7  ;;  %vm300_vm14 = vcmp.gt.f32.partialorder %v1402_v30, %v1422_v31  ;;  %v574_v43 = vmul.f32 %v434_v33, %v1377_v0  ;;  %v263_v48 = vmax.f32 %v1082_v15, %v1078_v12 }
  0x42   :  { %v868_v24 = vpop.eup %867  ;;  %v513_v2 = vadd.f32 0.19977711, %v493_v41  ;;  %v494_v28 = vmul.f32 %v782_v35, %v434_v33  ;;  %v380_v1 = vsel %vm300_vm14, %v360_v36, %v260_v21  ;;  %v1449_v36 = vmax.f32 %v1052_v61, %v1045_v57 }
  0x43   :  { %v1426_v42 = vmul.f32 %v868_v24, %v336_v13  ;;  %v870_v44 = vpop.eup %869  ;;  %v783_v9 = vadd.f32 -0.13877685, %v455_v14  ;;  %875 = vrcp.f32 %v380_v1  ;;  %v339_v14 = vsel %vm299_vm13, %v319_v63, %v1375_v54 }
  0x44   :  { %v533_v45 = vmul.f32 %v513_v2, %v433_v55  ;;  %v514_v41 = vadd.f32 0.19977711, %v494_v28  ;;  %v1438_v35 = vmul.f32 %v870_v44, %v337_v40  ;;  %v575_v44 = vmul.f32 %v435_v7, %v1397_v50 }
  0x45   :  { %v436_v24 = vmul.f32 %v1426_v42, %v1426_v42  ;;  %v495_v53 = vmul.f32 %v783_v9, %v435_v7  ;;  %v872_v55 = vpop.eup %871  ;;  %v340_v63 = vsel %vm300_vm14, %v320_v60, %v1402_v30 }
  0x46   :  { %v801_v13 = vadd.f32 -0.3333295, %v533_v45  ;;  %v534_v2 = vmul.f32 %v514_v41, %v434_v33  ;;  %v437_v28 = vmul.f32 %v1438_v35, %v1438_v35  ;;  %v1452_v45 = vmul.f32 %v872_v55, %v338_v37 }
  0x47   :  { %v456_v56 = vmul.f32 0.080537446, %v436_v24  ;;  %v515_v21 = vadd.f32 0.19977711, %v495_v53  ;;  %v1463_v53 = vmin.f32 %v1052_v61, %v1045_v57  ;;  %v1466_v55 = vmul.f32 0.41421357, %v1449_v36 }
  0x48   :  { %v593_v40 = vmul.f32 %v801_v13, %v573_v49  ;;  %v802_v9 = vadd.f32 -0.3333295, %v534_v2  ;;  %v457_v58 = vmul.f32 0.080537446, %v437_v28  ;;  %v438_v54 = vmul.f32 %v1452_v45, %v1452_v45 }
  0x49   :  { %v784_v1 = vadd.f32 -0.13877685, %v456_v56  ;;  %v535_v41 = vmul.f32 %v515_v21, %v435_v7  ;;  %v576_v60 = vmul.f32 %v436_v24, %v1426_v42  ;;  %v321_v16 = vsub.f32 %v1463_v53, %v1449_v36 }
  0x4a   :  { %v613_v33 = vadd.f32 %v593_v40, %v1353_v46  ;;  %v874_v49 = vpop.eup %873  ;;  %v594_v37 = vmul.f32 %v802_v9, %v574_v43  ;;  %v785_v56 = vadd.f32 -0.13877685, %v457_v58  ;;  %v458_v46 = vmul.f32 0.080537446, %v438_v54 }
  0x4b   :  { %v496_v13 = vmul.f32 %v784_v1, %v436_v24  ;;  %v803_v31 = vadd.f32 -0.3333295, %v535_v41  ;;  %v1470_v30 = vmul.f32 %v874_v49, %v339_v14  ;;  %v577_v58 = vmul.f32 %v437_v28, %v1438_v35 }
  0x4c   :  { %v633_v2 = vadd.f32 0.7853982, %v613_v33  ;;  %v614_v7 = vadd.f32 %v594_v37, %v1377_v0  ;;  %v497_v21 = vmul.f32 %v785_v56, %v437_v28  ;;  %v786_v1 = vadd.f32 -0.13877685, %v458_v46 }
  0x4d   :  { %v516_v40 = vadd.f32 0.19977711, %v496_v13  ;;  %v595_v9 = vmul.f32 %v803_v31, %v575_v44  ;;  %v876_v61 = vpop.eup %875  ;;  %v439_v14 = vmul.f32 %v1470_v30, %v1470_v30 }
  0x4e   :  { %v653_v43 = vsel %vm293_vm2, %v633_v2, %v613_v33  ;;  %v634_v41 = vadd.f32 0.7853982, %v614_v7  ;;  %v517_v39 = vadd.f32 0.19977711, %v497_v21  ;;  %v498_v0 = vmul.f32 %v786_v1, %v438_v54 }
  0x4f   :  { %v693_v57 = vsub.f32 1.5707964, %v653_v43  ;;  %v536_v38 = vmul.f32 %v516_v40, %v436_v24  ;;  %v615_v27 = vadd.f32 %v595_v9, %v1397_v50  ;;  %v1479_v49 = vmul.f32 %v876_v61, %v340_v63 }
  0x50   :  { %v654_v31 = vsel %vm294_vm3, %v634_v41, %v614_v7  ;;  %v537_v44 = vmul.f32 %v517_v39, %v437_v28  ;;  %vm301_vm2 = vcmp.gt.f32.partialorder %v1463_v53, %v1466_v55  ;;  %v518_v61 = vadd.f32 0.19977711, %v498_v0  ;;  %v2074_v55 = vld [vmem:[#allocation19_spill] sm:$0xff] }
  0x51   :  { %v713_v19 = vsel %vm673_vm0, %v693_v57, %v653_v43  ;;  %v804_v25 = vadd.f32 -0.3333295, %v536_v38  ;;  %v694_v33 = vsub.f32 1.5707964, %v654_v31  ;;  %v635_v37 = vadd.f32 0.7853982, %v615_v27 }
  0x52   :  { %v733_v24 = vmul.f32 4.3429446, %v713_v19  ;;  %v805_v13 = vadd.f32 -0.3333295, %v537_v44  ;;  %v459_v63 = vmul.f32 0.080537446, %v439_v14  ;;  %v440_v38 = vmul.f32 %v1479_v49, %v1479_v49 }
  0x53   :  { %v596_v50 = vmul.f32 %v804_v25, %v576_v60  ;;  %v714_v3 = vsel %vm674_vm1, %v694_v33, %v654_v31  ;;  %v655_v4 = vsel %vm295_vm4, %v635_v37, %v615_v27  ;;  %v361_v39 = vadd.f32 %v1449_v36, %v1463_v53 }
  0x54   :  { %753 = vst [vmem:[%s1975_s3] sm:$0xff] %v733_v24  ;;  %v734_v57 = vmul.f32 4.3429446, %v714_v3  ;;  %v695_v32 = vsub.f32 1.5707964, %v655_v4  ;;  %v597_v28 = vmul.f32 %v805_v13, %v577_v58  ;;  %v538_v56 = vmul.f32 %v518_v61, %v438_v54  ;;  %v2053_v3 = vld [vmem:[#allocation10_spill] sm:$0xff] }
  0x55   :  { %v616_v51 = vadd.f32 %v596_v50, %v1426_v42  ;;  %v578_v2 = vmul.f32 %v438_v54, %v1452_v45  ;;  %v787_v5 = vadd.f32 -0.13877685, %v459_v63  ;;  %v460_v11 = vmul.f32 0.080537446, %v440_v38 }
  0x56   :  { %754 = vst [vmem:[%s1975_s3 + $0x8] sm:$0xff] %v734_v57  ;;  %v715_v27 = vsel %vm675_vm5, %v695_v32, %v655_v4  ;;  %v617_v8 = vadd.f32 %v597_v28, %v1438_v35  ;;  %v381_v42 = vsel %vm301_vm2, %v361_v39, %v1449_v36  ;;  %v806_v54 = vadd.f32 -0.3333295, %v538_v56 }
  0x57   :  { %v636_v52 = vadd.f32 0.7853982, %v616_v51  ;;  %v735_v60 = vmul.f32 4.3429446, %v715_v27  ;;  %v499_v46 = vmul.f32 %v787_v5, %v439_v14  ;;  %v788_v7 = vadd.f32 -0.13877685, %v460_v11 }
  0x58   :  { %v637_v21 = vadd.f32 0.7853982, %v617_v8  ;;  %877 = vrcp.f32 %v381_v42  ;;  %v598_v35 = vmul.f32 %v806_v54, %v578_v2  ;;  %v579_v34 = vmul.f32 %v439_v14, %v1470_v30  ;;  %v2068_v42 = vld [vmem:[#allocation15_spill] sm:$0xff] }
  0x59   :  { %v656_v40 = vsel %vm296_vm8, %v636_v52, %v616_v51  ;;  %755 = vst [vmem:[%s1975_s3 + $0x10] sm:$0xff] %v735_v60  ;;  %v519_v43 = vadd.f32 0.19977711, %v499_v46  ;;  %v500_v9 = vmul.f32 %v788_v7, %v440_v38  ;;  %v262_v36 = vmax.f32 %v1066_v6, %v1054_v62 }
  0x5a   :  { %v696_v17 = vsub.f32 1.5707964, %v656_v40  ;;  %v657_v58 = vsel %vm297_vm9, %v637_v21, %v617_v8  ;;  %v618_v0 = vadd.f32 %v598_v35, %v1452_v45  ;;  %v341_v47 = vsel %vm301_vm2, %v321_v16, %v1463_v53 }
  0x5b   :  { %v697_v41 = vsub.f32 1.5707964, %v657_v58  ;;  %v539_v19 = vmul.f32 %v519_v43, %v439_v14  ;;  %v520_v59 = vadd.f32 0.19977711, %v500_v9  ;;  %v1541_v25 = vmul.f32 0.41421357, %v262_v36 }
  0x5c   :  { %v716_v1 = vsel %vm676_vm6, %v696_v17, %v656_v40  ;;  %v638_v24 = vadd.f32 0.7853982, %v618_v0  ;;  %v362_v22 = vadd.f32 %v262_v36, %v1529_v10  ;;  %v580_v33 = vmul.f32 %v440_v38, %v1479_v49 }
  0x5d   :  { %v736_v31 = vmul.f32 4.3429446, %v716_v1  ;;  %v717_v44 = vsel %vm677_vm7, %v697_v41, %v657_v58  ;;  %v807_v18 = vadd.f32 -0.3333295, %v539_v19  ;;  %v540_v14 = vmul.f32 %v520_v59, %v440_v38  ;;  %v2062_v1 = vld [vmem:[#allocation11_spill] sm:$0xff]  ;;  %v2063_v41 = vld [vmem:[#allocation12_spill] sm:$0xff] }
  0x5e   :  { %v737_v45 = vmul.f32 4.3429446, %v717_v44  ;;  %vm302_vm0 = vcmp.gt.f32.partialorder %v1529_v10, %v1541_v25  ;;  %v658_v23 = vsel %vm298_vm11, %v638_v24, %v618_v0  ;;  %v1561_v50 = vmin.f32 %v1082_v15, %v1078_v12 }
  0x5f   :  { %756 = vst [vmem:[%s1975_s3 + $0x18] sm:$0xff] %v736_v31  ;;  %v599_v29 = vmul.f32 %v807_v18, %v579_v34  ;;  %v382_v37 = vsel %vm302_vm0, %v362_v22, %v262_v36  ;;  %v698_v13 = vsub.f32 1.5707964, %v658_v23  ;;  %v808_v61 = vadd.f32 -0.3333295, %v540_v14  ;;  %v2064_v22 = vld [vmem:[#allocation13_spill] sm:$0xff] }
  0x60   :  { %757 = vst [vmem:[%s1975_s3 + $0x20] sm:$0xff] %v737_v45  ;;  %879 = vrcp.f32 %v382_v37  ;;  %v322_v63 = vsub.f32 %v1529_v10, %v262_v36  ;;  %v264_v4 = vmax.f32 %v2053_v3, %v1084_v20  ;;  %v1575_v28 = vmul.f32 0.41421357, %v263_v48  ;;  %v2065_v45 = vld [vmem:[#allocation14_spill] sm:$0xff] }
  0x61   :  { %v619_v26 = vadd.f32 %v599_v29, %v1470_v30  ;;  %v718_v32 = vsel %vm678_vm10, %v698_v13, %v658_v23  ;;  %v600_v51 = vmul.f32 %v808_v61, %v580_v33  ;;  %v1579_v56 = vmin.f32 %v2053_v3, %v1084_v20 }
  0x62   :  { %v878_v38 = vpop.eup %877  ;;  %v738_v2 = vmul.f32 4.3429446, %v718_v32  ;;  %v363_v11 = vadd.f32 %v263_v48, %v1561_v50  ;;  %vm303_vm1 = vcmp.gt.f32.partialorder %v1561_v50, %v1575_v28  ;;  %v1587_v52 = vmul.f32 0.41421357, %v264_v4 }
  0x63   :  { %v639_v5 = vadd.f32 0.7853982, %v619_v26  ;;  %v1581_v30 = vmul.f32 %v878_v38, %v341_v47  ;;  %v620_v27 = vadd.f32 %v600_v51, %v1479_v49  ;;  %v342_v21 = vsel %vm302_vm0, %v322_v63, %v1529_v10 }
  0x64   :  { %758 = vst [vmem:[%s1975_s3 + $0x28] sm:$0xff] %v738_v2  ;;  %v383_v49 = vsel %vm303_vm1, %v363_v11, %v263_v48  ;;  %vm304_vm3 = vcmp.gt.f32.partialorder %v1579_v56, %v1587_v52  ;;  %v364_v16 = vadd.f32 %v264_v4, %v1579_v56  ;;  %v323_v36 = vsub.f32 %v1561_v50, %v263_v48 }
  0x65   :  { %v659_v60 = vsel %vm299_vm13, %v639_v5, %v619_v26  ;;  %v441_v54 = vmul.f32 %v1581_v30, %v1581_v30  ;;  %v640_v7 = vadd.f32 0.7853982, %v620_v27  ;;  %881 = vrcp.f32 %v383_v49 }
  0x66   :  { %v699_v46 = vsub.f32 1.5707964, %v659_v60  ;;  %v1616_v0 = vmin.f32 %v2063_v41, %v2062_v1  ;;  %v384_v47 = vsel %vm304_vm3, %v364_v16, %v264_v4  ;;  %v324_v24 = vsub.f32 %v1579_v56, %v264_v4 }
  0x67   :  { %v461_v40 = vmul.f32 0.080537446, %v441_v54  ;;  %v660_v34 = vsel %vm300_vm14, %v640_v7, %v620_v27  ;;  %883 = vrcp.f32 %v384_v47  ;;  %v265_v18 = vmax.f32 %v2063_v41, %v2062_v1  ;;  %v2070_v7 = vld [vmem:[#allocation8_spill] sm:$0xff]  ;;  %v2073_v47 = vld [vmem:[#allocation18_spill] sm:$0xff] }
  0x68   :  { %v719_v43 = vsel %vm679_vm12, %v699_v46, %v659_v60  ;;  %v700_v31 = vsub.f32 1.5707964, %v660_v34  ;;  %v1626_v14 = vmin.f32 %v2065_v45, %v2064_v22  ;;  %v266_v61 = vmax.f32 %v2065_v45, %v2064_v22  ;;  %v2069_v60 = vld [vmem:[#allocation16_spill] sm:$0xff] }
  0x69   :  { %v739_v19 = vmul.f32 4.3429446, %v719_v43  ;;  %v789_v59 = vadd.f32 -0.13877685, %v461_v40  ;;  %v1638_v26 = vmul.f32 0.41421357, %v265_v18  ;;  %v365_v63 = vadd.f32 %v265_v18, %v1616_v0 }
  0x6a   :  { %v880_v44 = vpop.eup %879  ;;  %v720_v29 = vsel %vm680_vm15, %v700_v31, %v660_v34  ;;  %v1643_v39 = vmul.f32 0.41421357, %v266_v61  ;;  %v343_v57 = vsel %vm303_vm1, %v323_v36, %v1561_v50  ;;  %v366_v32 = vadd.f32 %v266_v61, %v1626_v14  ;;  %v2071_v40 = vld [vmem:[#allocation9_spill] sm:$0xff] }
  0x6b   :  { %759 = vst [vmem:[%s1975_s3 + $0x30] sm:$0xff] %v739_v19  ;;  %v501_v37 = vmul.f32 %v789_v59, %v441_v54  ;;  %v1634_v13 = vmul.f32 %v880_v44, %v342_v21  ;;  %v740_v48 = vmul.f32 4.3429446, %v720_v29  ;;  %vm305_vm4 = vcmp.gt.f32.partialorder %v1616_v0, %v1638_v26  ;;  %v2072_v59 = vld [vmem:[#allocation17_spill] sm:$0xff]  ;;  %v2078_v26 = vld [vmem:[#allocation23_spill] sm:$0xff] }
  0x6c   :  { %v581_v2 = vmul.f32 %v441_v54, %v1581_v30  ;;  %v344_v11 = vsel %vm304_vm3, %v324_v24, %v1579_v56  ;;  %v385_v8 = vsel %vm305_vm4, %v365_v63, %v265_v18  ;;  %vm306_vm5 = vcmp.gt.f32.partialorder %v1626_v14, %v1643_v39 }
  0x6d   :  { %v521_v4 = vadd.f32 0.19977711, %v501_v37  ;;  %v442_v38 = vmul.f32 %v1634_v13, %v1634_v13  ;;  %760 = vst [vmem:[%s1975_s3 + $0x38] sm:$0xff] %v740_v48  ;;  %v1667_v49 = vmin.f32 %v2069_v60, %v2068_v42  ;;  %vm681_vm6 = vcmp.gt.f32.partialorder %v2071_v40, %v2070_v7 }
  0x6e   :  { %885 = vrcp.f32 %v385_v8  ;;  %v325_v17 = vsub.f32 %v1616_v0, %v265_v18  ;;  %v326_v35 = vsub.f32 %v1626_v14, %v266_v61  ;;  %v386_v43 = vsel %vm306_vm5, %v366_v32, %v266_v61 }
  0x6f   :  { %v541_v51 = vmul.f32 %v521_v4, %v441_v54  ;;  %v462_v5 = vmul.f32 0.080537446, %v442_v38  ;;  %v882_v27 = vpop.eup %881  ;;  %v1671_v54 = vmax.f32 %v2069_v60, %v2068_v42  ;;  %887 = vrcp.f32 %v386_v43 }
  0x70   :  { %v1675_v16 = vmul.f32 %v882_v27, %v343_v57  ;;  %v1693_v44 = vmin.f32 %v2073_v47, %v2072_v59  ;;  %v268_v24 = vmax.f32 %v2073_v47, %v2072_v59  ;;  %v582_v23 = vmul.f32 %v442_v38, %v1634_v13 }
  0x71   :  { %v809_v46 = vadd.f32 -0.3333295, %v541_v51  ;;  %v790_v21 = vadd.f32 -0.13877685, %v462_v5  ;;  %v1683_v9 = vmul.f32 0.41421357, %v1671_v54  ;;  %v884_v19 = vpop.eup %883  ;;  %v367_v31 = vadd.f32 %v1671_v54, %v1667_v49 }
  0x72   :  { %v443_v36 = vmul.f32 %v1675_v16, %v1675_v16  ;;  %v1699_v37 = vmul.f32 %v884_v19, %v344_v11  ;;  %v345_v61 = vsel %vm305_vm4, %v325_v17, %v1616_v0  ;;  %v1709_v63 = vmul.f32 0.41421357, %v268_v24 }
  0x73   :  { %v601_v58 = vmul.f32 %v809_v46, %v581_v2  ;;  %v502_v34 = vmul.f32 %v790_v21, %v442_v38  ;;  %vm307_vm7 = vcmp.gt.f32.partialorder %v1667_v49, %v1683_v9  ;;  %v346_v51 = vsel %vm306_vm5, %v326_v35, %v1626_v14 }
  0x74   :  { %v463_v29 = vmul.f32 0.080537446, %v443_v36  ;;  %v387_v48 = vsel %vm307_vm7, %v367_v31, %v1671_v54  ;;  %v444_v32 = vmul.f32 %v1699_v37, %v1699_v37  ;;  %vm308_vm8 = vcmp.gt.f32.partialorder %v1693_v44, %v1709_v63 }
  0x75   :  { %v621_v18 = vadd.f32 %v601_v58, %v1581_v30  ;;  %v522_v33 = vadd.f32 0.19977711, %v502_v34  ;;  %889 = vrcp.f32 %v387_v48  ;;  %v368_v2 = vadd.f32 %v268_v24, %v1693_v44  ;;  %v2075_v34 = vld [vmem:[#allocation20_spill] sm:$0xff] }
  0x76   :  { %v791_v57 = vadd.f32 -0.13877685, %v463_v29  ;;  %vm682_vm9 = vcmp.gt.f32.partialorder %v1066_v6, %v1054_v62  ;;  %v327_v27 = vsub.f32 %v1667_v49, %v1671_v54  ;;  %v583_v46 = vmul.f32 %v443_v36, %v1675_v16 }
  0x77   :  { %v641_v4 = vadd.f32 0.7853982, %v621_v18  ;;  %v542_v30 = vmul.f32 %v522_v33, %v442_v38  ;;  %v464_v21 = vmul.f32 0.080537446, %v444_v32  ;;  %v328_v17 = vsub.f32 %v1693_v44, %v268_v24 }
  0x78   :  { %v503_v11 = vmul.f32 %v791_v57, %v443_v36  ;;  %v886_v35 = vpop.eup %885  ;;  %v388_v53 = vsel %vm308_vm8, %v368_v2, %v268_v24  ;;  %v1734_v19 = vmin.f32 %v2075_v34, %v2074_v55  ;;  %v1744_v24 = vmax.f32 %v2075_v34, %v2074_v55 }
  0x79   :  { %v661_v5 = vsel %vm301_vm2, %v641_v4, %v621_v18  ;;  %v810_v38 = vadd.f32 -0.3333295, %v542_v30  ;;  %v792_v31 = vadd.f32 -0.13877685, %v464_v21  ;;  %v1739_v18 = vmul.f32 %v886_v35, %v345_v61  ;;  %v888_v33 = vpop.eup %887 }
  0x7a   :  { %v701_v8 = vsub.f32 1.5707964, %v661_v5  ;;  %v523_v58 = vadd.f32 0.19977711, %v503_v11  ;;  %891 = vrcp.f32 %v388_v53  ;;  %v1748_v57 = vmul.f32 %v888_v33, %v346_v51 }
  0x7b   :  { %v602_v43 = vmul.f32 %v810_v38, %v582_v23  ;;  %v504_v4 = vmul.f32 %v792_v31, %v444_v32  ;;  %v445_v30 = vmul.f32 %v1739_v18, %v1739_v18  ;;  %v347_v7 = vsel %vm307_vm7, %v327_v27, %v1667_v49 }
  0x7c   :  { %v721_v54 = vsel %vm681_vm6, %v701_v8, %v661_v5  ;;  %v543_v48 = vmul.f32 %v523_v58, %v443_v36  ;;  %vm683_vm10 = vcmp.gt.f32.partialorder %v1082_v15, %v1078_v12  ;;  %v584_v36 = vmul.f32 %v444_v32, %v1699_v37 }
  0x7d   :  { %v741_v29 = vmul.f32 4.3429446, %v721_v54  ;;  %v622_v23 = vadd.f32 %v602_v43, %v1634_v13  ;;  %v1761_v61 = vmul.f32 0.41421357, %v1744_v24  ;;  %v524_v51 = vadd.f32 0.19977711, %v504_v4 }
  0x7e   :  { %v811_v40 = vadd.f32 -0.3333295, %v543_v48  ;;  %v465_v2 = vmul.f32 0.080537446, %v445_v30  ;;  %v446_v5 = vmul.f32 %v1748_v57, %v1748_v57  ;;  %v348_v38 = vsel %vm308_vm8, %v328_v17, %v1693_v44 }
  0x7f   :  { %761 = vst [vmem:[%s1975_s3 + $0x40] sm:$0xff] %v741_v29  ;;  %v642_v13 = vadd.f32 0.7853982, %v622_v23  ;;  %v890_v11 = vpop.eup %889  ;;  %vm309_vm11 = vcmp.gt.f32.partialorder %v1734_v19, %v1761_v61  ;;  %v369_v21 = vadd.f32 %v1744_v24, %v1734_v19  ;;  %v544_v43 = vmul.f32 %v524_v51, %v444_v32 }
  0x80   :  { %v603_v8 = vmul.f32 %v811_v40, %v583_v46  ;;  %v793_v58 = vadd.f32 -0.13877685, %v465_v2  ;;  %v466_v53 = vmul.f32 0.080537446, %v446_v5  ;;  %v585_v17 = vmul.f32 %v445_v30, %v1739_v18 }
  0x81   :  { %v662_v27 = vsel %vm302_vm0, %v642_v13, %v622_v23  ;;  %v1778_v31 = vmul.f32 %v890_v11, %v347_v7  ;;  %v329_v10 = vsub.f32 %v1734_v19, %v1744_v24  ;;  %v812_v46 = vadd.f32 -0.3333295, %v544_v43  ;;  %v2077_v43 = vld [vmem:[#allocation22_spill] sm:$0xff] }
  0x82   :  { %v702_v35 = vsub.f32 1.5707964, %v662_v27  ;;  %v623_v54 = vadd.f32 %v603_v8, %v1675_v16  ;;  %vm684_vm12 = vcmp.gt.f32.partialorder %v2053_v3, %v1084_v20  ;;  %v505_v32 = vmul.f32 %v793_v58, %v445_v30 }
  0x83   :  { %v794_v33 = vadd.f32 -0.13877685, %v466_v53  ;;  %v447_v16 = vmul.f32 %v1778_v31, %v1778_v31  ;;  %v389_v48 = vsel %vm309_vm11, %v369_v21, %v1744_v24  ;;  %v604_v7 = vmul.f32 %v812_v46, %v584_v36 }
  0x84   :  { %v722_v25 = vsel %vm682_vm9, %v702_v35, %v662_v27  ;;  %v643_v23 = vadd.f32 0.7853982, %v623_v54  ;;  %v892_v4 = vpop.eup %891  ;;  %v525_v62 = vadd.f32 0.19977711, %v505_v32  ;;  %893 = vrcp.f32 %v389_v48  ;;  %v2076_v35 = vld [vmem:[#allocation21_spill] sm:$0xff] }
  0x85   :  { %v742_v29 = vmul.f32 4.3429446, %v722_v25  ;;  %v506_v6 = vmul.f32 %v794_v33, %v446_v5  ;;  %v586_v40 = vmul.f32 %v446_v5, %v1748_v57  ;;  %v467_v51 = vmul.f32 0.080537446, %v447_v16 }
  0x86   :  { %v663_v13 = vsel %vm303_vm1, %v643_v23, %v623_v54  ;;  %v1800_v2 = vmul.f32 %v892_v4, %v348_v38  ;;  %v624_v24 = vadd.f32 %v604_v7, %v1699_v37  ;;  %v545_v36 = vmul.f32 %v525_v62, %v445_v30 }
  0x87   :  { %762 = vst [vmem:[%s1975_s3 + $0x48] sm:$0xff] %v742_v29  ;;  %v703_v11 = vsub.f32 1.5707964, %v663_v13  ;;  %v526_v27 = vadd.f32 0.19977711, %v506_v6  ;;  %v1807_v58 = vmin.f32 %v2077_v43, %v2076_v35  ;;  %v1811_v50 = vmax.f32 %v2077_v43, %v2076_v35 }
  0x88   :  { %v795_v8 = vadd.f32 -0.13877685, %v467_v51  ;;  %v448_v21 = vmul.f32 %v1800_v2, %v1800_v2  ;;  %v644_v38 = vadd.f32 0.7853982, %v624_v24  ;;  %v813_v37 = vadd.f32 -0.3333295, %v545_v36 }
  0x89   :  { %v723_v28 = vsel %vm683_vm10, %v703_v11, %v663_v13  ;;  %v546_v30 = vmul.f32 %v526_v27, %v446_v5  ;;  %vm685_vm13 = vcmp.gt.f32.partialorder %v2063_v41, %v2062_v1  ;;  %v1822_v29 = vmul.f32 0.41421357, %v1811_v50  ;;  %v2081_v1 = vld [vmem:[#allocation26_spill] sm:$0xff] }
  0x8a   :  { %v743_v53 = vmul.f32 4.3429446, %v723_v28  ;;  %v507_v54 = vmul.f32 %v795_v8, %v447_v16  ;;  %v468_v25 = vmul.f32 0.080537446, %v448_v21  ;;  %v664_v46 = vsel %vm304_vm3, %v644_v38, %v624_v24  ;;  %v2079_v38 = vld [vmem:[#allocation24_spill] sm:$0xff] }
  0x8b   :  { %v605_v32 = vmul.f32 %v813_v37, %v585_v17  ;;  %v814_v33 = vadd.f32 -0.3333295, %v546_v30  ;;  %v704_v12 = vsub.f32 1.5707964, %v664_v46  ;;  %v349_v23 = vsel %vm309_vm11, %v329_v10, %v1734_v19 }
  0x8c   :  { %763 = vst [vmem:[%s1975_s3 + $0x50] sm:$0xff] %v743_v53  ;;  %v527_v15 = vadd.f32 0.19977711, %v507_v54  ;;  %v796_v5 = vadd.f32 -0.13877685, %v468_v25  ;;  %vm310_vm14 = vcmp.gt.f32.partialorder %v1807_v58, %v1822_v29  ;;  %v370_v17 = vadd.f32 %v1811_v50, %v1807_v58 }
  0x8d   :  { %v625_v56 = vadd.f32 %v605_v32, %v1739_v18  ;;  %v606_v52 = vmul.f32 %v814_v33, %v586_v40  ;;  %v724_v48 = vsel %vm684_vm12, %v704_v12, %v664_v46  ;;  %v587_v7 = vmul.f32 %v447_v16, %v1778_v31  ;;  %v2080_v12 = vld [vmem:[#allocation25_spill] sm:$0xff] }
  0x8e   :  { %v547_v4 = vmul.f32 %v527_v15, %v447_v16  ;;  %v508_v62 = vmul.f32 %v796_v5, %v448_v21  ;;  %v894_v6 = vpop.eup %893  ;;  %v744_v13 = vmul.f32 4.3429446, %v724_v48  ;;  %v390_v40 = vsel %vm310_vm14, %v370_v17, %v1811_v50 }
  0x8f   :  { %v645_v10 = vadd.f32 0.7853982, %v625_v56  ;;  %v626_v18 = vadd.f32 %v606_v52, %v1748_v57  ;;  %v1845_v24 = vmul.f32 %v894_v6, %v349_v23  ;;  %895 = vrcp.f32 %v390_v40 }
  0x90   :  { %v815_v51 = vadd.f32 -0.3333295, %v547_v4  ;;  %v528_v11 = vadd.f32 0.19977711, %v508_v62  ;;  %764 = vst [vmem:[%s1975_s3 + $0x58] sm:$0xff] %v744_v13  ;;  %vm686_vm15 = vcmp.gt.f32.partialorder %v2065_v45, %v2064_v22  ;;  %v588_v57 = vmul.f32 %v448_v21, %v1800_v2 }
  0x91   :  { %v665_v20 = vsel %vm305_vm4, %v645_v10, %v625_v56  ;;  %v646_v3 = vadd.f32 0.7853982, %v626_v18  ;;  %v449_v8 = vmul.f32 %v1845_v24, %v1845_v24  ;;  %v330_v0 = vsub.f32 %v1807_v58, %v1811_v50 }
  0x92   :  { %v705_v16 = vsub.f32 1.5707964, %v665_v20  ;;  %v607_v36 = vmul.f32 %v815_v51, %v587_v7  ;;  %v548_v27 = vmul.f32 %v528_v11, %v448_v21  ;;  %v1865_v37 = vmin.f32 %v2079_v38, %v2078_v26 }
  0x93   :  { %v666_v28 = vsel %vm306_vm5, %v646_v3, %v626_v18  ;;  %v271_v30 = vmax.f32 %v2079_v38, %v2078_v26  ;;  %vm687_vm2 = vcmp.gt.f32.partialorder %v2069_v60, %v2068_v42  ;;  %v469_v39 = vmul.f32 0.080537446, %v449_v8 }
  0x94   :  { %v725_v21 = vsel %vm685_vm13, %v705_v16, %v665_v20  ;;  %v706_v53 = vsub.f32 1.5707964, %v666_v28  ;;  %v627_v54 = vadd.f32 %v607_v36, %v1778_v31  ;;  %v816_v25 = vadd.f32 -0.3333295, %v548_v27 }
  0x95   :  { %v745_v14 = vmul.f32 4.3429446, %v725_v21  ;;  %v1875_v50 = vmul.f32 0.41421357, %v271_v30  ;;  %v1882_v41 = vmin.f32 %v2081_v1, %v2080_v12  ;;  %v797_v15 = vadd.f32 -0.13877685, %v469_v39 }
  0x96   :  { %v726_v46 = vsel %vm686_vm15, %v706_v53, %v666_v28  ;;  %v647_v32 = vadd.f32 0.7853982, %v627_v54  ;;  %v608_v33 = vmul.f32 %v816_v25, %v588_v57  ;;  %v371_v5 = vadd.f32 %v271_v30, %v1865_v37 }
  0x97   :  { %765 = vst [vmem:[%s1975_s3 + $0x60] sm:$0xff] %v745_v14  ;;  %v746_v31 = vmul.f32 4.3429446, %v726_v46  ;;  %vm311_vm0 = vcmp.gt.f32.partialorder %v1865_v37, %v1875_v50  ;;  %v350_v23 = vsel %vm310_vm14, %v330_v0, %v1807_v58  ;;  %v272_v56 = vmax.f32 %v2081_v1, %v2080_v12 }
  0x98   :  { %v667_v22 = vsel %vm307_vm7, %v647_v32, %v627_v54  ;;  %v628_v45 = vadd.f32 %v608_v33, %v1800_v2  ;;  %v509_v17 = vmul.f32 %v797_v15, %v449_v8  ;;  %v391_v49 = vsel %vm311_vm0, %v371_v5, %v271_v30 }
  0x99   :  { %766 = vst [vmem:[%s1975_s3 + $0x68] sm:$0xff] %v746_v31  ;;  %v707_v52 = vsub.f32 1.5707964, %v667_v22  ;;  %v896_v9 = vpop.eup %895  ;;  %897 = vrcp.f32 %v391_v49  ;;  %v1906_v48 = vmul.f32 0.41421357, %v272_v56  ;;  %v372_v6 = vadd.f32 %v272_v56, %v1882_v41 }
  0x9a   :  { %v648_v2 = vadd.f32 0.7853982, %v628_v45  ;;  %v529_v7 = vadd.f32 0.19977711, %v509_v17  ;;  %v428_v62 = vmul.f32 %v896_v9, %v350_v23  ;;  %vm688_vm1 = vcmp.gt.f32.partialorder %v2073_v47, %v2072_v59 }
  0x9b   :  { %v727_v4 = vsel %vm687_vm2, %v707_v52, %v667_v22  ;;  %vm312_vm3 = vcmp.gt.f32.partialorder %v1882_v41, %v1906_v48  ;;  %v589_v42 = vmul.f32 %v449_v8, %v1845_v24  ;;  %v331_v51 = vsub.f32 %v1865_v37, %v271_v30 }
  0x9c   :  { %v747_v13 = vmul.f32 4.3429446, %v727_v4  ;;  %v668_v10 = vsel %vm308_vm8, %v648_v2, %v628_v45  ;;  %v549_v40 = vmul.f32 %v529_v7, %v449_v8  ;;  %v450_v60 = vmul.f32 %v428_v62, %v428_v62 }
  0x9d   :  { %v708_v18 = vsub.f32 1.5707964, %v668_v10  ;;  %v392_v44 = vsel %vm312_vm3, %v372_v6, %v272_v56  ;;  %v351_v57 = vsel %vm311_vm0, %v331_v51, %v1865_v37  ;;  %v332_v8 = vsub.f32 %v1882_v41, %v272_v56 }
  0x9e   :  { %767 = vst [vmem:[%s1975_s3 + $0x70] sm:$0xff] %v747_v13  ;;  %v817_v59 = vadd.f32 -0.3333295, %v549_v40  ;;  %v470_v47 = vmul.f32 0.080537446, %v450_v60  ;;  %899 = vrcp.f32 %v392_v44  ;;  %vm689_vm4 = vcmp.gt.f32.partialorder %v2075_v34, %v2074_v55 }
  0x9f   :  { %v728_v63 = vsel %vm688_vm1, %v708_v18, %v668_v10  ;;  %v590_v54 = vmul.f32 %v450_v60, %v428_v62  ;;  %vm690_vm5 = vcmp.gt.f32.partialorder %v2077_v43, %v2076_v35  ;;  %vm691_vm6 = vcmp.gt.f32.partialorder %v2079_v38, %v2078_v26 }
  0xa0   :  { %v748_v11 = vmul.f32 4.3429446, %v728_v63  ;;  %v609_v20 = vmul.f32 %v817_v59, %v589_v42  ;;  %v798_v3 = vadd.f32 -0.13877685, %v470_v47  ;;  %vm692_vm7 = vcmp.gt.f32.partialorder %v2081_v1, %v2080_v12 }
  0xa2   :  { %768 = vst [vmem:[%s1975_s3 + $0x78] sm:$0xff] %v748_v11  ;;  %v629_v16 = vadd.f32 %v609_v20, %v1845_v24  ;;  %v510_v36 = vmul.f32 %v798_v3, %v450_v60  ;;  %v352_v24 = vsel %vm312_vm3, %v332_v8, %v1882_v41 }
  0xa3   :  { %v898_v27 = vpop.eup %897 }
  0xa4   :  { %v649_v28 = vadd.f32 0.7853982, %v629_v16  ;;  %v530_v0 = vadd.f32 0.19977711, %v510_v36  ;;  %v430_v30 = vmul.f32 %v898_v27, %v351_v57 }
  0xa6   :  { %v669_v21 = vsel %vm309_vm11, %v649_v28, %v629_v16  ;;  %v550_v53 = vmul.f32 %v530_v0, %v450_v60  ;;  %v451_v25 = vmul.f32 %v430_v30, %v430_v30 }
  0xa7   :  { %v709_v14 = vsub.f32 1.5707964, %v669_v21 }
  0xa8   :  { %v818_v39 = vadd.f32 -0.3333295, %v550_v53  ;;  %v471_v46 = vmul.f32 0.080537446, %v451_v25  ;;  %v900_v32 = vpop.eup %899  ;;  %v591_v17 = vmul.f32 %v451_v25, %v430_v30 }
  0xa9   :  { %v729_v33 = vsel %vm689_vm4, %v709_v14, %v669_v21  ;;  %v432_v34 = vmul.f32 %v900_v32, %v352_v24 }
  0xaa   :  { %v749_v31 = vmul.f32 4.3429446, %v729_v33  ;;  %v610_v15 = vmul.f32 %v818_v39, %v590_v54  ;;  %v799_v55 = vadd.f32 -0.13877685, %v471_v46 }
  0xab   :  { %v452_v5 = vmul.f32 %v432_v34, %v432_v34 }
  0xac   :  { %769 = vst [vmem:[%s1975_s3 + $0x80] sm:$0xff] %v749_v31  ;;  %v630_v19 = vadd.f32 %v610_v15, %v428_v62  ;;  %v511_v61 = vmul.f32 %v799_v55, %v451_v25 }
  0xad   :  { %v472_v23 = vmul.f32 0.080537446, %v452_v5  ;;  %v592_v43 = vmul.f32 %v452_v5, %v432_v34 }
  0xae   :  { %v650_v22 = vadd.f32 0.7853982, %v630_v19  ;;  %v531_v45 = vadd.f32 0.19977711, %v511_v61 }
  0xaf   :  { %v800_v49 = vadd.f32 -0.13877685, %v472_v23 }
  0xb0   :  { %v670_v56 = vsel %vm310_vm14, %v650_v22, %v630_v19  ;;  %v551_v52 = vmul.f32 %v531_v45, %v451_v25 }
  0xb1   :  { %v710_v9 = vsub.f32 1.5707964, %v670_v56  ;;  %v512_v4 = vmul.f32 %v800_v49, %v452_v5 }
  0xb2   :  { %v819_v2 = vadd.f32 -0.3333295, %v551_v52 }
  0xb3   :  { %v730_v7 = vsel %vm690_vm5, %v710_v9, %v670_v56  ;;  %v532_v13 = vadd.f32 0.19977711, %v512_v4 }
  0xb4   :  { %v750_v62 = vmul.f32 4.3429446, %v730_v7  ;;  %v611_v6 = vmul.f32 %v819_v2, %v591_v17 }
  0xb5   :  { %v552_v35 = vmul.f32 %v532_v13, %v452_v5 }
  0xb6   :  { %770 = vst [vmem:[%s1975_s3 + $0x88] sm:$0xff] %v750_v62  ;;  %v631_v10 = vadd.f32 %v611_v6, %v430_v30 }
  0xb7   :  { %v820_v58 = vadd.f32 -0.3333295, %v552_v35 }
  0xb8   :  { %v651_v18 = vadd.f32 0.7853982, %v631_v10 }
  0xb9   :  { %v612_v40 = vmul.f32 %v820_v58, %v592_v43 }
  0xba   :  { %v671_v29 = vsel %vm311_vm0, %v651_v18, %v631_v10 }
  0xbb   :  { %v711_v42 = vsub.f32 1.5707964, %v671_v29  ;;  %v632_v60 = vadd.f32 %v612_v40, %v432_v34 }
  0xbd   :  { %v731_v51 = vsel %vm691_vm6, %v711_v42, %v671_v29  ;;  %v652_v63 = vadd.f32 0.7853982, %v632_v60 }
  0xbe   :  { %v751_v44 = vmul.f32 4.3429446, %v731_v51 }
  0xbf   :  { %v672_v59 = vsel %vm312_vm3, %v652_v63, %v632_v60 }
  0xc0   :  { %771 = vst [vmem:[%s1975_s3 + $0x90] sm:$0xff] %v751_v44  ;;  %v712_v37 = vsub.f32 1.5707964, %v672_v59 }
  0xc2   :  { %v732_v50 = vsel %vm692_vm7, %v712_v37, %v672_v59 }
  0xc3   :  { %v752_v26 = vmul.f32 4.3429446, %v732_v50 }
  0xc5   :  { %772 = vst [vmem:[%s1975_s3 + $0x98] sm:$0xff] %v752_v26 }

</bundles_post_ra>
